<compile_context>
chip_gen: v5e
topology: v5e:2x2
jax: 0.10.0
libtpu: 0.0.40
codegen_flags: <defaults>
</compile_context>

<pallas_src>
import functools

import numpy as np
import jax
import jax.numpy as jnp
from jax import lax
from jax.experimental import pallas as pl
from jax.experimental.pallas import tpu as pltpu

BN_EPS = 1e-5
LANE = 128


def _round_up(x, m):
    return (x + m - 1) // m * m


def _vmem_limits():
    """Generation-aware scoped-VMEM limit and per-step working-set budget."""
    cap = 64 * 1024 * 1024                                # conservative default (v7x)
    try:
        info = pltpu.get_tpu_info()
        cap = int(getattr(info, "vmem_capacity_bytes", cap) or cap)
    except Exception:
        pass
    limit = min(cap * 3 // 4, 100 * 1024 * 1024)          # ~48 MiB v7x, ~96 MiB v5e/v6e
    return limit // 3, limit                              # (per-step budget, limit)


# ---------------------------------------------------------------------------
# Kernel: conv = kh MXU matmuls over width-packed rows (K = kw*Cin); row taps
# are whole-row (sublane-aligned) shifts accumulated into a f32 VMEM scratch.
# Fused epilogue: BN shift (scale pre-folded into W), optional residual, ReLU.
# One grid step = (nb samples) x (one Cout tile).
# ---------------------------------------------------------------------------
def _conv_bn_kernel(x_ref, w_ref, shift_ref, *rest, kh, stride, wo, ho, nb,
                    relu, has_shortcut):
    if has_shortcut:
        sc_ref, o_ref, acc_ref = rest
    else:
        o_ref, acc_ref = rest

    rows = acc_ref.shape[0]                               # nb * Hq * Wo
    tc = o_ref.shape[-1]

    for dh in range(kh):                                  # static unroll (kh <= 3)
        a = dh % stride                                   # row-phase plane
        off = (dh // stride) * wo                         # whole-row shift
        res = jnp.dot(x_ref[a], w_ref[dh],                # (rows,K)@(K,tc) on MXU
                      preferred_element_type=jnp.float32)
        if dh == 0:
            acc_ref[...] = res                            # off == 0 when dh == 0
        elif off == 0:
            acc_ref[...] += res
        else:
            # acc[r] += res[r + off]; the rows beyond each sample's valid
            # Ho*Wo window absorb any cross-sample garbage, so one flat
            # (sublane-aligned: off is a multiple of Wo) shifted add is exact.
            acc_ref[0:rows - off, :] += res[off:rows, :]

    acc = acc_ref[...].reshape(nb, rows // nb, tc)
    y = acc[:, :ho * wo, :] + shift_ref[...].reshape(1, 1, tc)   # BN shift only
    if has_shortcut:
        y = y + sc_ref[...].astype(jnp.float32)                  # residual add
    if relu:
        y = jnp.maximum(y, 0.0)
    o_ref[...] = y.astype(o_ref.dtype)                           # lane-dense store


# ---------------------------------------------------------------------------
# Wrapper: conv (kh x kw, pad=k//2, stride) + eval-mode BN [+ residual] [+ ReLU]
# ---------------------------------------------------------------------------
def fused_conv_bn(x_nhwc, w_hwio, bn_params, *, stride=1, relu=True,
                  shortcut=None, out_dtype=jnp.float32):
    """Returns (out, (Ho, Wo, Cp)) with out of shape (N, Ho*Wo, Cp);
    Cp = Cout rounded up to a multiple of 128 (extra columns are zero).
    `shortcut`, if given, must be shaped (N, Ho*Wo, Cp)."""
    N, H, W, Cin = x_nhwc.shape
    kh, kw, wcin, Cout = w_hwio.shape
    assert wcin == Cin

    # A 1x1 stride-s conv is a plain matmul on the subsampled grid.
    if kh == 1 and kw == 1 and stride > 1:
        x_nhwc = x_nhwc[:, ::stride, ::stride, :]
        N, H, W, Cin = x_nhwc.shape
        stride = 1
    s = stride
    ph, pw = kh // 2, kw // 2
    Ho = (H + 2 * ph - kh) // s + 1
    Wo = (W + 2 * pw - kw) // s + 1

    # --- fold BN scale into the weights (f32); keep only the shift ----------
    gamma, beta, mean, var = bn_params
    scale = gamma / jnp.sqrt(var + BN_EPS)
    shift = beta - mean * scale
    wk = (w_hwio.astype(jnp.float32) * scale.reshape(1, 1, 1, Cout))
    wk = wk.reshape(kh, kw * Cin, Cout)                   # K-packed weights

    # --- lane-dense output: pad Cout up to a multiple of 128 ----------------
    Cp = _round_up(Cout, LANE)
    if Cp != Cout:
        wk = jnp.pad(wk, ((0, 0), (0, 0), (0, Cp - Cout)))
        shift = jnp.pad(shift, (0, Cp - Cout))
    wk = wk.astype(jnp.bfloat16)
    shift2 = shift.reshape(1, Cp).astype(jnp.float32)

    # --- spatial zero-pad, width-pack taps into K, row-phase decompose ------
    xp = jnp.pad(x_nhwc.astype(jnp.bfloat16),
                 ((0, 0), (ph, ph), (pw, pw), (0, 0)))
    Hp = xp.shape[1]
    cols = [xp[:, :, dw:dw + s * (Wo - 1) + 1:s, :] for dw in range(kw)]
    xk = cols[0] if kw == 1 else jnp.concatenate(cols, axis=-1)   # (N,Hp,Wo,kw*Cin)
    K = kw * Cin
    Hq = _round_up(Hp, s) // s
    if Hq * s != Hp:
        xk = jnp.pad(xk, ((0, 0), (0, Hq * s - Hp), (0, 0), (0, 0)))
    if s == 1:
        xph = xk.reshape(1, N * Hq * Wo, K)
    else:
        xph = xk.reshape(N, Hq, s, Wo, K)
        xph = jnp.transpose(xph, (2, 0, 1, 3, 4)).reshape(s, N * Hq * Wo, K)
    rows1 = Hq * Wo                                       # per-sample plane rows

    # --- generation-aware tiling ---------------------------------------------
    budget, vmem_limit = _vmem_limits()
    out_isz = np.dtype(out_dtype).itemsize
    sc_isz = np.dtype(shortcut.dtype).itemsize if shortcut is not None else 0

    def step_bytes(tc, nb):
        rows = nb * rows1
        io = s * rows * K * 2                             # input planes (bf16)
        io += kh * K * tc * 2 + tc * 4                    # weight tile + shift
        io += nb * Ho * Wo * tc * (out_isz + sc_isz)      # output (+ shortcut) tile
        return 2 * io + rows * tc * 4                     # dbl-buffered IO + f32 scratch

    tc = LANE                                             # v5e MXU width
    for cand in (512, 256):                               # v6e/v7x MXU N width is 256
        if Cp % cand == 0 and step_bytes(cand, 1) <= budget:
            tc = cand
            break

    valid_nb = [d for d in range(1, N + 1)
                if N % d == 0 and (d == N or (d * rows1) % 8 == 0)]
    nb = valid_nb[0]
    for d in valid_nb:                                    # batch samples while M is small
        if step_bytes(tc, d) > budget:
            break
        nb = d
        if d * rows1 >= 512:
            break

    kernel = functools.partial(
        _conv_bn_kernel, kh=kh, stride=s, wo=Wo, ho=Ho, nb=nb,
        relu=relu, has_shortcut=shortcut is not None)

    # The input plane block is reused across the (inner) Cout-tile axis, so it
    # is fetched once per sample group; default double-buffering kept.
    in_specs = [
        pl.BlockSpec((s, nb * rows1, K), lambda n, j: (0, n, 0)),
        pl.BlockSpec((kh, K, tc), lambda n, j: (0, 0, j)),
        pl.BlockSpec((1, tc), lambda n, j: (0, j)),
    ]
    args = [xph, wk, shift2]
    if shortcut is not None:
        in_specs.append(pl.BlockSpec((nb, Ho * Wo, tc), lambda n, j: (n, 0, j)))
        args.append(shortcut)

    out = pl.pallas_call(
        kernel,
        out_shape=jax.ShapeDtypeStruct((N, Ho * Wo, Cp), out_dtype),
        grid_spec=pltpu.PrefetchScalarGridSpec(
            num_scalar_prefetch=0,
            grid=(N // nb, Cp // tc),
            in_specs=in_specs,
            out_specs=pl.BlockSpec((nb, Ho * Wo, tc), lambda n, j: (n, 0, j)),
            scratch_shapes=[pltpu.VMEM((nb * rows1, tc), jnp.float32)],
        ),
        compiler_params=pltpu.CompilerParams(
            # Split across cores only on the sample axis; keeping the Cout-tile
            # axis inside one core preserves the fetch-once-per-sample reuse.
            dimension_semantics=("parallel", "arbitrary"),
            vmem_limit_bytes=vmem_limit),
    )(*args)
    return out, (Ho, Wo, Cp)


# ---------------------------------------------------------------------------
# BasicBlock forward (NHWC)
# ---------------------------------------------------------------------------
def basic_block_forward(x_nhwc, params, stride):
    N, H, W, Cin = x_nhwc.shape
    Cout = params["w1"].shape[-1]

    # conv1 (3x3, stride) + BN1 + ReLU -> bf16, lane-dense Cp channels
    h1, (Ho, Wo, Cp) = fused_conv_bn(x_nhwc, params["w1"], params["bn1"],
                                     stride=stride, relu=True,
                                     out_dtype=jnp.bfloat16)
    h1_nhwc = h1.reshape(N, Ho, Wo, Cp)

    # shortcut branch (bf16 residual operand)
    if stride != 1 or Cin != Cout:
        ws = params["ws"].reshape(1, 1, Cin, Cout)
        short, _ = fused_conv_bn(x_nhwc, ws, params["bns"], stride=stride,
                                 relu=False, out_dtype=jnp.bfloat16)
    else:
        short = x_nhwc.reshape(N, Ho * Wo, Cin).astype(jnp.bfloat16)
        if Cp != Cin:
            short = jnp.pad(short, ((0, 0), (0, 0), (0, Cp - Cin)))

    # conv2 (3x3, stride 1) + BN2 + residual add + ReLU fused in one kernel.
    # h1 carries Cp channels (zero-padded); pad conv2's input-channel dim too.
    w2 = params["w2"]
    if Cp != Cout:
        w2 = jnp.pad(w2, ((0, 0), (0, 0), (0, Cp - Cout), (0, 0)))
    out, _ = fused_conv_bn(h1_nhwc, w2, params["bn2"], stride=1, relu=True,
                           shortcut=short, out_dtype=jnp.float32)
    out = out.reshape(N, Ho, Wo, Cp)
    return out[..., :Cout] if Cp != Cout else out


# ---------------------------------------------------------------------------
# Pure-JAX reference (lax.conv) for correctness check
# ---------------------------------------------------------------------------
def ref_forward(x_nhwc, params, stride):
    dn = ("NHWC", "HWIO", "NHWC")

    def bn(y, bn_params):
        g, b, m, v = bn_params
        return (y - m) / jnp.sqrt(v + BN_EPS) * g + b

    h = lax.conv_general_dilated(x_nhwc, params["w1"], (stride, stride),
                                 ((1, 1), (1, 1)), dimension_numbers=dn)
    h = jax.nn.relu(bn(h, params["bn1"]))
    h = lax.conv_general_dilated(h, params["w2"], (1, 1),
                                 ((1, 1), (1, 1)), dimension_numbers=dn)
    h = bn(h, params["bn2"])

    Cin, Cout = x_nhwc.shape[-1], params["w1"].shape[-1]
    if stride != 1 or Cin != Cout:
        s = lax.conv_general_dilated(x_nhwc, params["ws"].reshape(1, 1, Cin, Cout),
                                     (stride, stride), ((0, 0), (0, 0)),
                                     dimension_numbers=dn)
        s = bn(s, params["bns"])
    else:
        s = x_nhwc
    return jax.nn.relu(h + s)


# ---------------------------------------------------------------------------
if __name__ == "__main__":
    key = jax.random.PRNGKey(0)
    block_fn = jax.jit(basic_block_forward, static_argnums=(2,))

    def make_params(k, cin, cout, need_proj):
        ks = jax.random.split(k, 16)

        def bn(k0, k1, k2, k3):
            return (jax.random.uniform(k0, (cout,), minval=0.5, maxval=1.5),
                    jax.random.normal(k1, (cout,)) * 0.1,
                    jax.random.normal(k2, (cout,)) * 0.1,
                    jax.random.uniform(k3, (cout,), minval=0.5, maxval=1.5))

        p = {"w1": jax.random.normal(ks[0], (3, 3, cin, cout), jnp.float32) * 0.1,
             "w2": jax.random.normal(ks[1], (3, 3, cout, cout), jnp.float32) * 0.1,
             "bn1": bn(ks[2], ks[3], ks[4], ks[5]),
             "bn2": bn(ks[6], ks[7], ks[8], ks[9])}
        if need_proj:
            p["ws"] = jax.random.normal(ks[10], (cin, cout), jnp.float32) * 0.1
            p["bns"] = bn(ks[11], ks[12], ks[13], ks[14])
        return p

    # (N, Cin, H, W, Cout, stride): downsampling block + identity-shortcut block
    configs = [(2, 4, 16, 16, 8, 2),
               (2, 8, 16, 16, 8, 1)]
    for cfg in configs:
        N, Cin, H, W, Cout, stride = cfg
        kp, kx, key = jax.random.split(key, 3)
        params = make_params(kp, Cin, Cout, stride != 1 or Cin != Cout)

        # Input built in NCHW (PyTorch convention), transposed to NHWC.
        x_nchw = jax.random.normal(kx, (N, Cin, H, W), jnp.float32)
        x_nhwc = jnp.transpose(x_nchw, (0, 2, 3, 1))

        out = jax.block_until_ready(block_fn(x_nhwc, params, stride))
        ref = jax.block_until_ready(ref_forward(x_nhwc, params, stride))

        assert out.shape == (N, H // stride, W // stride, Cout), (cfg, out.shape)
        max_err = float(jnp.max(jnp.abs(out - ref)))
        # bf16 MXU operands + bf16 h1/shortcut intermediates -> relaxed tolerance.
        assert jnp.allclose(out, ref, atol=4e-2, rtol=4e-2), (cfg, max_err)

    print("KERNEL_OK")
</pallas_src>

<mosaic_0001>
module attributes {stable_mosaic.version = 11 : i64} {
  func.func @_conv_bn_kernel(%arg0: i32, %arg1: i32, %arg2: memref<1x128x4xbf16, #tpu.memory_space<vmem>>, %arg3: memref<1x4x128xbf16, #tpu.memory_space<vmem>>, %arg4: memref<1x128xf32, #tpu.memory_space<vmem>>, %arg5: memref<2x64x128xbf16, #tpu.memory_space<vmem>>, %arg6: memref<128x128xf32, #tpu.memory_space<vmem>>) attributes {dimension_semantics = [#tpu.dimension_semantics<parallel>, #tpu.dimension_semantics<arbitrary>], iteration_bounds = array<i64: 1, 1>, scalar_prefetch = 0 : i64, scratch_operands = 1 : i64, tpu.core_type = #tpu.core_type<tc>, window_params = [{transform_indices = @transform_0, window_bounds = array<i64: 1, 128, 4>}, {transform_indices = @transform_1, window_bounds = array<i64: 1, 4, 128>}, {transform_indices = @transform_2, window_bounds = array<i64: 1, 128>}, {transform_indices = @transform_3, window_bounds = array<i64: 2, 64, 128>}]} {
    %c0 = arith.constant 0 : index
    %c0_0 = arith.constant 0 : index
    %c0_1 = arith.constant 0 : index
    %0 = vector.load %arg2[%c0, %c0_0, %c0_1] : memref<1x128x4xbf16, #tpu.memory_space<vmem>>, vector<1x128x4xbf16>
    %1 = vector.shape_cast %0 : vector<1x128x4xbf16> to vector<128x4xbf16>
    %c0_2 = arith.constant 0 : index
    %c0_3 = arith.constant 0 : index
    %c0_4 = arith.constant 0 : index
    %2 = vector.load %arg3[%c0_2, %c0_3, %c0_4] : memref<1x4x128xbf16, #tpu.memory_space<vmem>>, vector<1x4x128xbf16>
    %3 = vector.shape_cast %2 : vector<1x4x128xbf16> to vector<4x128xbf16>
    %cst = arith.constant dense<0.000000e+00> : vector<128x128xf32>
    %4 = tpu.matmul %1, %3, %cst {dimension_numbers = #tpu.dot_dimension_numbers<[1], [0], [0], [1], [0, 0, 1, 1], [], []>} : vector<128x4xbf16>, vector<4x128xbf16>, vector<128x128xf32> -> vector<128x128xf32>
    %c0_5 = arith.constant 0 : index
    %c0_6 = arith.constant 0 : index
    %5 = vector.load %arg6[%c0_5, %c0_6] : memref<128x128xf32, #tpu.memory_space<vmem>>, vector<128x128xf32>
    tpu.vector_store %arg6[%c0_5, %c0_6], %4 {strides = array<i32>} : memref<128x128xf32, #tpu.memory_space<vmem>>, vector<128x128xf32>,
    %c0_7 = arith.constant 0 : index
    %c0_8 = arith.constant 0 : index
    %6 = vector.load %arg6[%c0_7, %c0_8] : memref<128x128xf32, #tpu.memory_space<vmem>>, vector<128x128xf32>
    %7 = vector.shape_cast %6 : vector<128x128xf32> to vector<2x64x128xf32>
    %c0_9 = arith.constant 0 : index
    %c0_10 = arith.constant 0 : index
    %8 = vector.load %arg4[%c0_9, %c0_10] : memref<1x128xf32, #tpu.memory_space<vmem>>, vector<1x128xf32>
    %9 = vector.shape_cast %8 : vector<1x128xf32> to vector<1x1x128xf32>
    %10 = vector.broadcast %9 : vector<1x1x128xf32> to vector<2x64x128xf32>
    %11 = arith.addf %7, %10 : vector<2x64x128xf32>
    %12 = arith.truncf %11 : vector<2x64x128xf32> to vector<2x64x128xbf16>
    %c0_11 = arith.constant 0 : index
    %c0_12 = arith.constant 0 : index
    %c0_13 = arith.constant 0 : index
    %13 = vector.load %arg5[%c0_11, %c0_12, %c0_13] : memref<2x64x128xbf16, #tpu.memory_space<vmem>>, vector<2x64x128xbf16>
    tpu.vector_store %arg5[%c0_11, %c0_12, %c0_13], %12 {strides = array<i32>} : memref<2x64x128xbf16, #tpu.memory_space<vmem>>, vector<2x64x128xbf16>,
    return
  }
  func.func @transform_0(%arg0: i32, %arg1: i32) -> (i32, i32, i32) {
    %c0_i32 = arith.constant 0 : i32
    %c0_i32_0 = arith.constant 0 : i32
    %c0_i32_1 = arith.constant 0 : i32
    return %c0_i32, %arg0, %c0_i32_0 : i32, i32, i32
  }
  func.func @transform_1(%arg0: i32, %arg1: i32) -> (i32, i32, i32) {
    %c0_i32 = arith.constant 0 : i32
    %c0_i32_0 = arith.constant 0 : i32
    %c0_i32_1 = arith.constant 0 : i32
    return %c0_i32, %c0_i32_0, %arg1 : i32, i32, i32
  }
  func.func @transform_2(%arg0: i32, %arg1: i32) -> (i32, i32) {
    %c0_i32 = arith.constant 0 : i32
    %c0_i32_0 = arith.constant 0 : i32
    return %c0_i32, %arg1 : i32, i32
  }
  func.func @transform_3(%arg0: i32, %arg1: i32) -> (i32, i32, i32) {
    %c0_i32 = arith.constant 0 : i32
    %c0_i32_0 = arith.constant 0 : i32
    return %arg0, %c0_i32, %arg1 : i32, i32, i32
  }
}

module attributes {stable_mosaic.version = 11 : i64} {
  func.func @_conv_bn_kernel(%arg0: i32, %arg1: i32, %arg2: memref<2x144x12xbf16, #tpu.memory_space<vmem>>, %arg3: memref<3x12x128xbf16, #tpu.memory_space<vmem>>, %arg4: memref<1x128xf32, #tpu.memory_space<vmem>>, %arg5: memref<2x64x128xbf16, #tpu.memory_space<vmem>>, %arg6: memref<144x128xf32, #tpu.memory_space<vmem>>) attributes {dimension_semantics = [#tpu.dimension_semantics<parallel>, #tpu.dimension_semantics<arbitrary>], iteration_bounds = array<i64: 1, 1>, scalar_prefetch = 0 : i64, scratch_operands = 1 : i64, tpu.core_type = #tpu.core_type<tc>, window_params = [{transform_indices = @transform_0, window_bounds = array<i64: 2, 144, 12>}, {transform_indices = @transform_1, window_bounds = array<i64: 3, 12, 128>}, {transform_indices = @transform_2, window_bounds = array<i64: 1, 128>}, {transform_indices = @transform_3, window_bounds = array<i64: 2, 64, 128>}]} {
    %c0 = arith.constant 0 : index
    %c0_0 = arith.constant 0 : index
    %c0_1 = arith.constant 0 : index
    %0 = vector.load %arg2[%c0, %c0_0, %c0_1] : memref<2x144x12xbf16, #tpu.memory_space<vmem>>, vector<1x144x12xbf16>
    %1 = vector.shape_cast %0 : vector<1x144x12xbf16> to vector<144x12xbf16>
    %c0_2 = arith.constant 0 : index
    %c0_3 = arith.constant 0 : index
    %c0_4 = arith.constant 0 : index
    %2 = vector.load %arg3[%c0_2, %c0_3, %c0_4] : memref<3x12x128xbf16, #tpu.memory_space<vmem>>, vector<1x12x128xbf16>
    %3 = vector.shape_cast %2 : vector<1x12x128xbf16> to vector<12x128xbf16>
    %cst = arith.constant dense<0.000000e+00> : vector<144x128xf32>
    %4 = tpu.matmul %1, %3, %cst {dimension_numbers = #tpu.dot_dimension_numbers<[1], [0], [0], [1], [0, 0, 1, 1], [], []>} : vector<144x12xbf16>, vector<12x128xbf16>, vector<144x128xf32> -> vector<144x128xf32>
    %c0_5 = arith.constant 0 : index
    %c0_6 = arith.constant 0 : index
    %5 = vector.load %arg6[%c0_5, %c0_6] : memref<144x128xf32, #tpu.memory_space<vmem>>, vector<144x128xf32>
    tpu.vector_store %arg6[%c0_5, %c0_6], %4 {strides = array<i32>} : memref<144x128xf32, #tpu.memory_space<vmem>>, vector<144x128xf32>,
    %c1 = arith.constant 1 : index
    %c0_7 = arith.constant 0 : index
    %c0_8 = arith.constant 0 : index
    %6 = vector.load %arg2[%c1, %c0_7, %c0_8] : memref<2x144x12xbf16, #tpu.memory_space<vmem>>, vector<1x144x12xbf16>
    %7 = vector.shape_cast %6 : vector<1x144x12xbf16> to vector<144x12xbf16>
    %c1_9 = arith.constant 1 : index
    %c0_10 = arith.constant 0 : index
    %c0_11 = arith.constant 0 : index
    %8 = vector.load %arg3[%c1_9, %c0_10, %c0_11] : memref<3x12x128xbf16, #tpu.memory_space<vmem>>, vector<1x12x128xbf16>
    %9 = vector.shape_cast %8 : vector<1x12x128xbf16> to vector<12x128xbf16>
    %cst_12 = arith.constant dense<0.000000e+00> : vector<144x128xf32>
    %10 = tpu.matmul %7, %9, %cst_12 {dimension_numbers = #tpu.dot_dimension_numbers<[1], [0], [0], [1], [0, 0, 1, 1], [], []>} : vector<144x12xbf16>, vector<12x128xbf16>, vector<144x128xf32> -> vector<144x128xf32>
    %c0_13 = arith.constant 0 : index
    %c0_14 = arith.constant 0 : index
    %11 = vector.load %arg6[%c0_13, %c0_14] : memref<144x128xf32, #tpu.memory_space<vmem>>, vector<144x128xf32>
    %12 = arith.addf %11, %10 : vector<144x128xf32>
    %c0_15 = arith.constant 0 : index
    %c0_16 = arith.constant 0 : index
    %13 = vector.load %arg6[%c0_15, %c0_16] : memref<144x128xf32, #tpu.memory_space<vmem>>, vector<144x128xf32>
    tpu.vector_store %arg6[%c0_15, %c0_16], %12 {strides = array<i32>} : memref<144x128xf32, #tpu.memory_space<vmem>>, vector<144x128xf32>,
    %c0_17 = arith.constant 0 : index
    %c0_18 = arith.constant 0 : index
    %c0_19 = arith.constant 0 : index
    %14 = vector.load %arg2[%c0_17, %c0_18, %c0_19] : memref<2x144x12xbf16, #tpu.memory_space<vmem>>, vector<1x144x12xbf16>
    %15 = vector.shape_cast %14 : vector<1x144x12xbf16> to vector<144x12xbf16>
    %c2 = arith.constant 2 : index
    %c0_20 = arith.constant 0 : index
    %c0_21 = arith.constant 0 : index
    %16 = vector.load %arg3[%c2, %c0_20, %c0_21] : memref<3x12x128xbf16, #tpu.memory_space<vmem>>, vector<1x12x128xbf16>
    %17 = vector.shape_cast %16 : vector<1x12x128xbf16> to vector<12x128xbf16>
    %cst_22 = arith.constant dense<0.000000e+00> : vector<144x128xf32>
    %18 = tpu.matmul %15, %17, %cst_22 {dimension_numbers = #tpu.dot_dimension_numbers<[1], [0], [0], [1], [0, 0, 1, 1], [], []>} : vector<144x12xbf16>, vector<12x128xbf16>, vector<144x128xf32> -> vector<144x128xf32>
    %c0_23 = arith.constant 0 : index
    %c0_24 = arith.constant 0 : index
    %19 = vector.load %arg6[%c0_23, %c0_24] : memref<144x128xf32, #tpu.memory_space<vmem>>, vector<136x128xf32>
    %20 = vector.extract_strided_slice %18 {offsets = [8, 0], sizes = [136, 128], strides = [1, 1]} : vector<144x128xf32> to vector<136x128xf32>
    %21 = arith.addf %19, %20 : vector<136x128xf32>
    %c0_25 = arith.constant 0 : index
    %c0_26 = arith.constant 0 : index
    %22 = vector.load %arg6[%c0_25, %c0_26] : memref<144x128xf32, #tpu.memory_space<vmem>>, vector<136x128xf32>
    tpu.vector_store %arg6[%c0_25, %c0_26], %21 {strides = array<i32>} : memref<144x128xf32, #tpu.memory_space<vmem>>, vector<136x128xf32>,
    %c0_27 = arith.constant 0 : index
    %c0_28 = arith.constant 0 : index
    %23 = vector.load %arg6[%c0_27, %c0_28] : memref<144x128xf32, #tpu.memory_space<vmem>>, vector<144x128xf32>
    %24 = vector.shape_cast %23 : vector<144x128xf32> to vector<2x72x128xf32>
    %25 = vector.extract_strided_slice %24 {offsets = [0, 0, 0], sizes = [2, 64, 128], strides = [1, 1, 1]} : vector<2x72x128xf32> to vector<2x64x128xf32>
    %c0_29 = arith.constant 0 : index
    %c0_30 = arith.constant 0 : index
    %26 = vector.load %arg4[%c0_29, %c0_30] : memref<1x128xf32, #tpu.memory_space<vmem>>, vector<1x128xf32>
    %27 = vector.shape_cast %26 : vector<1x128xf32> to vector<1x1x128xf32>
    %28 = vector.broadcast %27 : vector<1x1x128xf32> to vector<2x64x128xf32>
    %29 = arith.addf %25, %28 : vector<2x64x128xf32>
    %cst_31 = arith.constant 0.000000e+00 : f32
    %30 = vector.broadcast %cst_31 : f32 to vector<2x64x128xf32>
    %31 = arith.maximumf %29, %30 : vector<2x64x128xf32>
    %32 = arith.truncf %31 : vector<2x64x128xf32> to vector<2x64x128xbf16>
    %c0_32 = arith.constant 0 : index
    %c0_33 = arith.constant 0 : index
    %c0_34 = arith.constant 0 : index
    %33 = vector.load %arg5[%c0_32, %c0_33, %c0_34] : memref<2x64x128xbf16, #tpu.memory_space<vmem>>, vector<2x64x128xbf16>
    tpu.vector_store %arg5[%c0_32, %c0_33, %c0_34], %32 {strides = array<i32>} : memref<2x64x128xbf16, #tpu.memory_space<vmem>>, vector<2x64x128xbf16>,
    return
  }
  func.func @transform_0(%arg0: i32, %arg1: i32) -> (i32, i32, i32) {
    %c0_i32 = arith.constant 0 : i32
    %c0_i32_0 = arith.constant 0 : i32
    %c0_i32_1 = arith.constant 0 : i32
    return %c0_i32, %arg0, %c0_i32_0 : i32, i32, i32
  }
  func.func @transform_1(%arg0: i32, %arg1: i32) -> (i32, i32, i32) {
    %c0_i32 = arith.constant 0 : i32
    %c0_i32_0 = arith.constant 0 : i32
    %c0_i32_1 = arith.constant 0 : i32
    return %c0_i32, %c0_i32_0, %arg1 : i32, i32, i32
  }
  func.func @transform_2(%arg0: i32, %arg1: i32) -> (i32, i32) {
    %c0_i32 = arith.constant 0 : i32
    %c0_i32_0 = arith.constant 0 : i32
    return %c0_i32, %arg1 : i32, i32
  }
  func.func @transform_3(%arg0: i32, %arg1: i32) -> (i32, i32, i32) {
    %c0_i32 = arith.constant 0 : i32
    %c0_i32_0 = arith.constant 0 : i32
    return %arg0, %c0_i32, %arg1 : i32, i32, i32
  }
}

module attributes {stable_mosaic.version = 11 : i64} {
  func.func @_conv_bn_kernel(%arg0: i32, %arg1: i32, %arg2: memref<1x160x384xbf16, #tpu.memory_space<vmem>>, %arg3: memref<3x384x128xbf16, #tpu.memory_space<vmem>>, %arg4: memref<1x128xf32, #tpu.memory_space<vmem>>, %arg5: memref<2x64x128xbf16, #tpu.memory_space<vmem>>, %arg6: memref<2x64x128xf32, #tpu.memory_space<vmem>>, %arg7: memref<160x128xf32, #tpu.memory_space<vmem>>) attributes {dimension_semantics = [#tpu.dimension_semantics<parallel>, #tpu.dimension_semantics<arbitrary>], iteration_bounds = array<i64: 1, 1>, scalar_prefetch = 0 : i64, scratch_operands = 1 : i64, tpu.core_type = #tpu.core_type<tc>, window_params = [{transform_indices = @transform_0, window_bounds = array<i64: 1, 160, 384>}, {transform_indices = @transform_1, window_bounds = array<i64: 3, 384, 128>}, {transform_indices = @transform_2, window_bounds = array<i64: 1, 128>}, {transform_indices = @transform_3, window_bounds = array<i64: 2, 64, 128>}, {transform_indices = @transform_4, window_bounds = array<i64: 2, 64, 128>}]} {
    %c0 = arith.constant 0 : index
    %c0_0 = arith.constant 0 : index
    %c0_1 = arith.constant 0 : index
    %0 = vector.load %arg2[%c0, %c0_0, %c0_1] : memref<1x160x384xbf16, #tpu.memory_space<vmem>>, vector<1x160x384xbf16>
    %1 = vector.shape_cast %0 : vector<1x160x384xbf16> to vector<160x384xbf16>
    %c0_2 = arith.constant 0 : index
    %c0_3 = arith.constant 0 : index
    %c0_4 = arith.constant 0 : index
    %2 = vector.load %arg3[%c0_2, %c0_3, %c0_4] : memref<3x384x128xbf16, #tpu.memory_space<vmem>>, vector<1x384x128xbf16>
    %3 = vector.shape_cast %2 : vector<1x384x128xbf16> to vector<384x128xbf16>
    %cst = arith.constant dense<0.000000e+00> : vector<160x128xf32>
    %4 = tpu.matmul %1, %3, %cst {dimension_numbers = #tpu.dot_dimension_numbers<[1], [0], [0], [1], [0, 0, 1, 1], [], []>} : vector<160x384xbf16>, vector<384x128xbf16>, vector<160x128xf32> -> vector<160x128xf32>
    %c0_5 = arith.constant 0 : index
    %c0_6 = arith.constant 0 : index
    %5 = vector.load %arg7[%c0_5, %c0_6] : memref<160x128xf32, #tpu.memory_space<vmem>>, vector<160x128xf32>
    tpu.vector_store %arg7[%c0_5, %c0_6], %4 {strides = array<i32>} : memref<160x128xf32, #tpu.memory_space<vmem>>, vector<160x128xf32>,
    %c0_7 = arith.constant 0 : index
    %c0_8 = arith.constant 0 : index
    %c0_9 = arith.constant 0 : index
    %6 = vector.load %arg2[%c0_7, %c0_8, %c0_9] : memref<1x160x384xbf16, #tpu.memory_space<vmem>>, vector<1x160x384xbf16>
    %7 = vector.shape_cast %6 : vector<1x160x384xbf16> to vector<160x384xbf16>
    %c1 = arith.constant 1 : index
    %c0_10 = arith.constant 0 : index
    %c0_11 = arith.constant 0 : index
    %8 = vector.load %arg3[%c1, %c0_10, %c0_11] : memref<3x384x128xbf16, #tpu.memory_space<vmem>>, vector<1x384x128xbf16>
    %9 = vector.shape_cast %8 : vector<1x384x128xbf16> to vector<384x128xbf16>
    %cst_12 = arith.constant dense<0.000000e+00> : vector<160x128xf32>
    %10 = tpu.matmul %7, %9, %cst_12 {dimension_numbers = #tpu.dot_dimension_numbers<[1], [0], [0], [1], [0, 0, 1, 1], [], []>} : vector<160x384xbf16>, vector<384x128xbf16>, vector<160x128xf32> -> vector<160x128xf32>
    %c0_13 = arith.constant 0 : index
    %c0_14 = arith.constant 0 : index
    %11 = vector.load %arg7[%c0_13, %c0_14] : memref<160x128xf32, #tpu.memory_space<vmem>>, vector<152x128xf32>
    %12 = vector.extract_strided_slice %10 {offsets = [8, 0], sizes = [152, 128], strides = [1, 1]} : vector<160x128xf32> to vector<152x128xf32>
    %13 = arith.addf %11, %12 : vector<152x128xf32>
    %c0_15 = arith.constant 0 : index
    %c0_16 = arith.constant 0 : index
    %14 = vector.load %arg7[%c0_15, %c0_16] : memref<160x128xf32, #tpu.memory_space<vmem>>, vector<152x128xf32>
    tpu.vector_store %arg7[%c0_15, %c0_16], %13 {strides = array<i32>} : memref<160x128xf32, #tpu.memory_space<vmem>>, vector<152x128xf32>,
    %c0_17 = arith.constant 0 : index
    %c0_18 = arith.constant 0 : index
    %c0_19 = arith.constant 0 : index
    %15 = vector.load %arg2[%c0_17, %c0_18, %c0_19] : memref<1x160x384xbf16, #tpu.memory_space<vmem>>, vector<1x160x384xbf16>
    %16 = vector.shape_cast %15 : vector<1x160x384xbf16> to vector<160x384xbf16>
    %c2 = arith.constant 2 : index
    %c0_20 = arith.constant 0 : index
    %c0_21 = arith.constant 0 : index
    %17 = vector.load %arg3[%c2, %c0_20, %c0_21] : memref<3x384x128xbf16, #tpu.memory_space<vmem>>, vector<1x384x128xbf16>
    %18 = vector.shape_cast %17 : vector<1x384x128xbf16> to vector<384x128xbf16>
    %cst_22 = arith.constant dense<0.000000e+00> : vector<160x128xf32>
    %19 = tpu.matmul %16, %18, %cst_22 {dimension_numbers = #tpu.dot_dimension_numbers<[1], [0], [0], [1], [0, 0, 1, 1], [], []>} : vector<160x384xbf16>, vector<384x128xbf16>, vector<160x128xf32> -> vector<160x128xf32>
    %c0_23 = arith.constant 0 : index
    %c0_24 = arith.constant 0 : index
    %20 = vector.load %arg7[%c0_23, %c0_24] : memref<160x128xf32, #tpu.memory_space<vmem>>, vector<144x128xf32>
    %21 = vector.extract_strided_slice %19 {offsets = [16, 0], sizes = [144, 128], strides = [1, 1]} : vector<160x128xf32> to vector<144x128xf32>
    %22 = arith.addf %20, %21 : vector<144x128xf32>
    %c0_25 = arith.constant 0 : index
    %c0_26 = arith.constant 0 : index
    %23 = vector.load %arg7[%c0_25, %c0_26] : memref<160x128xf32, #tpu.memory_space<vmem>>, vector<144x128xf32>
    tpu.vector_store %arg7[%c0_25, %c0_26], %22 {strides = array<i32>} : memref<160x128xf32, #tpu.memory_space<vmem>>, vector<144x128xf32>,
    %c0_27 = arith.constant 0 : index
    %c0_28 = arith.constant 0 : index
    %24 = vector.load %arg7[%c0_27, %c0_28] : memref<160x128xf32, #tpu.memory_space<vmem>>, vector<160x128xf32>
    %25 = vector.shape_cast %24 : vector<160x128xf32> to vector<2x80x128xf32>
    %26 = vector.extract_strided_slice %25 {offsets = [0, 0, 0], sizes = [2, 64, 128], strides = [1, 1, 1]} : vector<2x80x128xf32> to vector<2x64x128xf32>
    %c0_29 = arith.constant 0 : index
    %c0_30 = arith.constant 0 : index
    %27 = vector.load %arg4[%c0_29, %c0_30] : memref<1x128xf32, #tpu.memory_space<vmem>>, vector<1x128xf32>
    %28 = vector.shape_cast %27 : vector<1x128xf32> to vector<1x1x128xf32>
    %29 = vector.broadcast %28 : vector<1x1x128xf32> to vector<2x64x128xf32>
    %30 = arith.addf %26, %29 : vector<2x64x128xf32>
    %c0_31 = arith.constant 0 : index
    %c0_32 = arith.constant 0 : index
    %c0_33 = arith.constant 0 : index
    %31 = vector.load %arg5[%c0_31, %c0_32, %c0_33] : memref<2x64x128xbf16, #tpu.memory_space<vmem>>, vector<2x64x128xbf16>
    %32 = arith.extf %31 : vector<2x64x128xbf16> to vector<2x64x128xf32>
    %33 = arith.addf %30, %32 : vector<2x64x128xf32>
    %cst_34 = arith.constant 0.000000e+00 : f32
    %34 = vector.broadcast %cst_34 : f32 to vector<2x64x128xf32>
    %35 = arith.maximumf %33, %34 : vector<2x64x128xf32>
    %c0_35 = arith.constant 0 : index
    %c0_36 = arith.constant 0 : index
    %c0_37 = arith.constant 0 : index
    %36 = vector.load %arg6[%c0_35, %c0_36, %c0_37] : memref<2x64x128xf32, #tpu.memory_space<vmem>>, vector<2x64x128xf32>
    tpu.vector_store %arg6[%c0_35, %c0_36, %c0_37], %35 {strides = array<i32>} : memref<2x64x128xf32, #tpu.memory_space<vmem>>, vector<2x64x128xf32>,
    return
  }
  func.func @transform_0(%arg0: i32, %arg1: i32) -> (i32, i32, i32) {
    %c0_i32 = arith.constant 0 : i32
    %c0_i32_0 = arith.constant 0 : i32
    %c0_i32_1 = arith.constant 0 : i32
    return %c0_i32, %arg0, %c0_i32_0 : i32, i32, i32
  }
  func.func @transform_1(%arg0: i32, %arg1: i32) -> (i32, i32, i32) {
    %c0_i32 = arith.constant 0 : i32
    %c0_i32_0 = arith.constant 0 : i32
    %c0_i32_1 = arith.constant 0 : i32
    return %c0_i32, %c0_i32_0, %arg1 : i32, i32, i32
  }
  func.func @transform_2(%arg0: i32, %arg1: i32) -> (i32, i32) {
    %c0_i32 = arith.constant 0 : i32
    %c0_i32_0 = arith.constant 0 : i32
    return %c0_i32, %arg1 : i32, i32
  }
  func.func @transform_3(%arg0: i32, %arg1: i32) -> (i32, i32, i32) {
    %c0_i32 = arith.constant 0 : i32
    %c0_i32_0 = arith.constant 0 : i32
    return %arg0, %c0_i32, %arg1 : i32, i32, i32
  }
  func.func @transform_4(%arg0: i32, %arg1: i32) -> (i32, i32, i32) {
    %c0_i32 = arith.constant 0 : i32
    %c0_i32_0 = arith.constant 0 : i32
    return %arg0, %c0_i32, %arg1 : i32, i32, i32
  }
}

</mosaic_0001>

<bundles_post_ra>
// kernel: basic_block_forward.4
= control target key start
LH: loop header
LB: loop body
LE: loop exit
PB: predicated region body
PF: predicated region fallthrough
CT: control target
= control target key end

     0   :  { %vm97_vm0 = vcmask 1041408   ;;  %vm72_vm1 = vcmask 31744   ;;  %s419_s1 = inlined_call_operand.vmem [shape: bf16[1,4,128], index: 1, kind: input, shape index: {}]   ;;  %s420_s0 = inlined_call_operand.vmem [shape: bf16[1,128,4], index: 0, kind: input, shape index: {}]   ;;  %s421_s2 = inlined_call_operand.vmem [shape: f32[1,128], index: 2, kind: input, shape index: {}]   ;;  %s422_s3 = inlined_call_operand.vmem [shape: bf16[2,64,128], index: 3, kind: output, shape index: {}]  }
   0x1   :  { %v31_v0 = vld [vmem:[%s419_s1] sm:$0x3]  ;;  %v280_v3 = vld [vmem:[%s420_s0 + $0x10] sm:$0xff]  ;;  %v279_v6 = vld [vmem:[%s420_s0 + $0x8] sm:$0xff] }
   0x2   :  { %v99_v1 = vsel %vm97_vm0, %v31_v0, 0  ;;  %v278_v2 = vld [vmem:[%s420_s0] sm:$0xff]  ;;  %v284_v5 = vld [vmem:[%s420_s0 + $0x30] sm:$0xff]  ;;  %v281_v7 = vld [vmem:[%s420_s0 + $0x18] sm:$0xff] }
   0x3   :  { %108 = vmatpush.bf16.msra.mxu0 %v99_v1  ;;  %333 = vmatpush.bf16.msra.mxu1 %v99_v1  ;;  %v282_v4 = vld [vmem:[%s420_s0 + $0x20] sm:$0xff]  ;;  %v283_v8 = vld [vmem:[%s420_s0 + $0x28] sm:$0xff]  ;;  %v285_v9 = vld [vmem:[%s420_s0 + $0x38] sm:$0xff] }
   0x4   :  { %334 = vmatpush.bf16.msra.mxu2 %v99_v1  ;;  %335 = vmatpush.bf16.msra.mxu3 %v99_v1  ;;  %v336_v12 = vld [vmem:[%s421_s2] ss:$0 sm:$0xff] }
   0x6   :  { %270 = vmatmul.msk.bf16.vlgmr.msra.gmra.mxu0 %vm72_vm1, %v278_v2  ;;  %272 = vmatmul.msk.bf16.vlgmr.msra.gmra.mxu1 %vm72_vm1, %v280_v3 }
   0x7   :  { %274 = vmatmul.msk.bf16.vlgmr.msra.gmra.mxu2 %vm72_vm1, %v282_v4  ;;  %276 = vmatmul.msk.bf16.vlgmr.msra.gmra.mxu3 %vm72_vm1, %v284_v5 }
  0x16   :  { %271 = vmatmul.msk.bf16.gmra.mxu0 %vm72_vm1, %v279_v6  ;;  %273 = vmatmul.msk.bf16.gmra.mxu1 %vm72_vm1, %v281_v7 }
  0x17   :  { %275 = vmatmul.msk.bf16.gmra.mxu2 %vm72_vm1, %v283_v8  ;;  %277 = vmatmul.msk.bf16.gmra.mxu3 %vm72_vm1, %v285_v9 }
  0x83   :  { %v110_v10 = vpop.f32.mrf.mxu0  ;;  %v120_v11 = vpop.f32.mrf.mxu1 }
  0x84   :  { %v186_v17 = vadd.f32 %v336_v12, %v110_v10  ;;  %v190_v18 = vadd.f32 %v336_v12, %v120_v11 }
  0x8a   :  { %v130_v13 = vpop.f32.mrf.mxu2  ;;  %v140_v14 = vpop.f32.mrf.mxu3 }
  0x8b   :  { %v112_v15 = vpop.f32.mrf.mxu0  ;;  %v122_v16 = vpop.f32.mrf.mxu1  ;;  %v194_v25 = vadd.f32 %v336_v12, %v130_v13  ;;  %v198_v26 = vadd.f32 %v336_v12, %v140_v14 }
  0x8c   :  { %v187_v19 = vadd.f32 %v336_v12, %v112_v15  ;;  %v191_v20 = vadd.f32 %v336_v12, %v122_v16 }
  0x8e   :  { %v289_v21 = vpack.c.bf16 %v187_v19, %v186_v17  ;;  %v299_v22 = vpack.c.bf16 %v191_v20, %v190_v18 }
  0x90   :  { %290 = vst [vmem:[%s422_s3] sm:$0xff] %v289_v21  }
  0x91   :  { %327 = vst [vmem:[%s422_s3 + $0x10] sm:$0xff] %v299_v22  }
  0x92   :  { %v132_v23 = vpop.f32.mrf.mxu2  ;;  %v142_v24 = vpop.f32.mrf.mxu3 }
  0x93   :  { %v195_v27 = vadd.f32 %v336_v12, %v132_v23  ;;  %v199_v28 = vadd.f32 %v336_v12, %v142_v24  ;;  %v115_v29 = vpop.f32.mrf.mxu0  ;;  %v125_v30 = vpop.f32.mrf.mxu1 }
  0x94   :  { %v188_v37 = vadd.f32 %v336_v12, %v115_v29  ;;  %v192_v38 = vadd.f32 %v336_v12, %v125_v30 }
  0x95   :  { %v309_v31 = vpack.c.bf16 %v195_v27, %v194_v25  ;;  %v319_v32 = vpack.c.bf16 %v199_v28, %v198_v26 }
  0x97   :  { %329 = vst [vmem:[%s422_s3 + $0x20] sm:$0xff] %v309_v31  }
  0x98   :  { %331 = vst [vmem:[%s422_s3 + $0x30] sm:$0xff] %v319_v32  }
  0x9a   :  { %v135_v33 = vpop.f32.mrf.mxu2  ;;  %v145_v34 = vpop.f32.mrf.mxu3 }
  0x9b   :  { %v117_v35 = vpop.f32.mrf.mxu0  ;;  %v127_v36 = vpop.f32.mrf.mxu1  ;;  %v196_v45 = vadd.f32 %v336_v12, %v135_v33  ;;  %v200_v46 = vadd.f32 %v336_v12, %v145_v34 }
  0x9c   :  { %v189_v39 = vadd.f32 %v336_v12, %v117_v35  ;;  %v193_v40 = vadd.f32 %v336_v12, %v127_v36 }
  0x9e   :  { %v294_v41 = vpack.c.bf16 %v189_v39, %v188_v37  ;;  %v304_v42 = vpack.c.bf16 %v193_v40, %v192_v38 }
  0xa0   :  { %326 = vst [vmem:[%s422_s3 + $0x8] sm:$0xff] %v294_v41  }
  0xa1   :  { %328 = vst [vmem:[%s422_s3 + $0x18] sm:$0xff] %v304_v42  }
  0xa2   :  { %v137_v43 = vpop.f32.mrf.mxu2  ;;  %v147_v44 = vpop.f32.mrf.mxu3 }
  0xa3   :  { %v197_v47 = vadd.f32 %v336_v12, %v137_v43  ;;  %v201_v48 = vadd.f32 %v336_v12, %v147_v44 }
  0xa5   :  { %v314_v49 = vpack.c.bf16 %v197_v47, %v196_v45  ;;  %v324_v50 = vpack.c.bf16 %v201_v48, %v200_v46 }
  0xa7   :  { %330 = vst [vmem:[%s422_s3 + $0x28] sm:$0xff] %v314_v49  }
  0xa8   :  { %332 = vst [vmem:[%s422_s3 + $0x38] sm:$0xff] %v324_v50  }

// kernel: basic_block_forward.3
= control target key start
LH: loop header
LB: loop body
LE: loop exit
PB: predicated region body
PF: predicated region fallthrough
CT: control target
= control target key end

     0   :  { %vm113_vm0 = vcmask 1045504   ;;  %vm85_vm1 = vcmask 97280   ;;  %s1145_s1 = inlined_call_operand.vmem [shape: bf16[3,12,128], index: 1, kind: input, shape index: {}]   ;;  %s1146_s0 = inlined_call_operand.vmem [shape: bf16[2,144,12], index: 0, kind: input, shape index: {}]   ;;  %s1147_s2 = inlined_call_operand.vmem [shape: f32[1,128], index: 2, kind: input, shape index: {}]   ;;  %s1148_s3 = inlined_call_operand.vmem [shape: bf16[2,64,128], index: 3, kind: output, shape index: {}]  }
   0x1   :  { %v730_v0 = vld [vmem:[%s1145_s1] sm:$0xf]  ;;  %v870_v1 = vld [vmem:[%s1145_s1] sm:$0x30]  ;;  %v799_v2 = vld [vmem:[%s1145_s1 + $0x8] sm:$0xf] }
   0x2   :  { %v731_v3 = vor.u32 %v870_v1, %v730_v0  ;;  %v880_v4 = vld [vmem:[%s1145_s1 + $0x8] sm:$0x30]  ;;  %v850_v5 = vld [vmem:[%s1145_s1 + $0x10] sm:$0xf]  ;;  %v890_v6 = vld [vmem:[%s1145_s1 + $0x10] sm:$0x30] }
   0x3   :  { %v800_v7 = vor.u32 %v880_v4, %v799_v2  ;;  %v851_v8 = vor.u32 %v890_v6, %v850_v5  ;;  %v861_v10 = vld [vmem:[%s1146_s0] sm:$0xff]  ;;  %v868_v11 = vld [vmem:[%s1146_s0 + $0x38] sm:$0xff]  ;;  %v871_v14 = vld [vmem:[%s1146_s0 + $0x48] sm:$0xff] }
   0x4   :  { %v115_v9 = vsel %vm113_vm0, %v731_v3, 0  ;;  %v881_v15 = vld [vmem:[%s1146_s0] sm:$0xff]  ;;  %v862_v16 = vld [vmem:[%s1146_s0 + $0x8] sm:$0xff]  ;;  %v872_v18 = vld [vmem:[%s1146_s0 + $0x50] sm:$0xff] }
   0x5   :  { %124 = vmatpush.bf16.msra.mxu0 %v115_v9  ;;  %938 = vmatpush.bf16.msra.mxu3 %v115_v9  ;;  %v289_v12 = vsel %vm113_vm0, %v800_v7, 0  ;;  %v498_v13 = vsel %vm113_vm0, %v851_v8, 0  ;;  %v869_v17 = vld [vmem:[%s1146_s0 + $0x40] sm:$0xff]  ;;  %v882_v19 = vld [vmem:[%s1146_s0 + $0x8] sm:$0xff]  ;;  %v863_v20 = vld [vmem:[%s1146_s0 + $0x10] sm:$0xff] }
   0x6   :  { %298 = vmatpush.bf16.msra.mxu1 %v289_v12  ;;  %507 = vmatpush.bf16.msra.mxu2 %v498_v13  ;;  %v878_v21 = vld [vmem:[%s1146_s0 + $0x80] sm:$0xff]  ;;  %v873_v22 = vld [vmem:[%s1146_s0 + $0x58] sm:$0xff]  ;;  %v883_v23 = vld [vmem:[%s1146_s0 + $0x10] sm:$0xff] }
   0x7   :  { %v864_v24 = vld [vmem:[%s1146_s0 + $0x18] sm:$0xff]  ;;  %v879_v25 = vld [vmem:[%s1146_s0 + $0x88] sm:$0xff]  ;;  %v874_v26 = vld [vmem:[%s1146_s0 + $0x60] sm:$0xff] }
   0x8   :  { %732 = vmatmul.msk.bf16.vlgmr.msra.gmra.mxu0 %vm85_vm1, %v861_v10  ;;  %739 = vmatmul.msk.bf16.vlgmr.msra.gmra.mxu3 %vm85_vm1, %v868_v11  ;;  %v884_v27 = vld [vmem:[%s1146_s0 + $0x18] sm:$0xff]  ;;  %v865_v28 = vld [vmem:[%s1146_s0 + $0x20] sm:$0xff]  ;;  %v875_v30 = vld [vmem:[%s1146_s0 + $0x68] sm:$0xff] }
   0x9   :  { %939 = vmatpush.bf16.msrb.mxu3 %v289_v12  ;;  %801 = vmatmul.msk.bf16.vlgmr.msra.gmra.mxu1 %vm85_vm1, %v871_v14  ;;  %v888_v29 = vld [vmem:[%s1146_s0 + $0x38] sm:$0xff]  ;;  %v885_v31 = vld [vmem:[%s1146_s0 + $0x20] sm:$0xff]  ;;  %v866_v32 = vld [vmem:[%s1146_s0 + $0x28] sm:$0xff] }
   0xa   :  { %852 = vmatmul.msk.bf16.vlgmr.msra.gmra.mxu2 %vm85_vm1, %v881_v15  ;;  %v889_v33 = vld [vmem:[%s1146_s0 + $0x40] sm:$0xff]  ;;  %v876_v34 = vld [vmem:[%s1146_s0 + $0x70] sm:$0xff]  ;;  %v886_v35 = vld [vmem:[%s1146_s0 + $0x28] sm:$0xff] }
   0xb   :  { %v867_v36 = vld [vmem:[%s1146_s0 + $0x30] sm:$0xff]  ;;  %v877_v37 = vld [vmem:[%s1146_s0 + $0x78] sm:$0xff]  ;;  %v1096_v51 = vld [vmem:[%s1147_s2] ss:$0 sm:$0xff] }
   0xc   :  { %v887_v38 = vld [vmem:[%s1146_s0 + $0x30] sm:$0xff] }
   0xd   :  { %940 = vmatpush.bf16.msra.mxu3 %v498_v13 }
  0x18   :  { %733 = vmatmul.msk.bf16.gmra.mxu0 %vm85_vm1, %v862_v16  ;;  %740 = vmatmul.msk.bf16.gmra.mxu3 %vm85_vm1, %v869_v17 }
  0x19   :  { %802 = vmatmul.msk.bf16.gmra.mxu1 %vm85_vm1, %v872_v18 }
  0x1a   :  { %853 = vmatmul.msk.bf16.gmra.mxu2 %vm85_vm1, %v882_v19 }
  0x28   :  { %734 = vmatmul.msk.bf16.gmra.mxu0 %vm85_vm1, %v863_v20  ;;  %808 = vmatmul.msk.bf16.vlgmr.msrb.gmra.mxu3 %vm85_vm1, %v878_v21 }
  0x29   :  { %803 = vmatmul.msk.bf16.gmra.mxu1 %vm85_vm1, %v873_v22 }
  0x2a   :  { %854 = vmatmul.msk.bf16.gmra.mxu2 %vm85_vm1, %v883_v23 }
  0x38   :  { %735 = vmatmul.msk.bf16.gmra.mxu0 %vm85_vm1, %v864_v24  ;;  %809 = vmatmul.msk.bf16.gmra.mxu3 %vm85_vm1, %v879_v25 }
  0x39   :  { %804 = vmatmul.msk.bf16.gmra.mxu1 %vm85_vm1, %v874_v26 }
  0x3a   :  { %855 = vmatmul.msk.bf16.gmra.mxu2 %vm85_vm1, %v884_v27 }
  0x48   :  { %736 = vmatmul.msk.bf16.gmra.mxu0 %vm85_vm1, %v865_v28  ;;  %859 = vmatmul.msk.bf16.vlgmr.msra.gmra.mxu3 %vm85_vm1, %v888_v29 }
  0x49   :  { %805 = vmatmul.msk.bf16.gmra.mxu1 %vm85_vm1, %v875_v30 }
  0x4a   :  { %856 = vmatmul.msk.bf16.gmra.mxu2 %vm85_vm1, %v885_v31 }
  0x58   :  { %737 = vmatmul.msk.bf16.gmra.mxu0 %vm85_vm1, %v866_v32  ;;  %860 = vmatmul.msk.bf16.gmra.mxu3 %vm85_vm1, %v889_v33 }
  0x59   :  { %806 = vmatmul.msk.bf16.gmra.mxu1 %vm85_vm1, %v876_v34 }
  0x5a   :  { %857 = vmatmul.msk.bf16.gmra.mxu2 %vm85_vm1, %v886_v35 }
  0x68   :  { %738 = vmatmul.msk.bf16.gmra.mxu0 %vm85_vm1, %v867_v36 }
  0x69   :  { %807 = vmatmul.msk.bf16.gmra.mxu1 %vm85_vm1, %v877_v37 }
  0x6a   :  { %858 = vmatmul.msk.bf16.gmra.mxu2 %vm85_vm1, %v887_v38 }
  0x85   :  { %v126_v39 = vpop.f32.mrf.mxu0 }
  0x86   :  { %v300_v40 = vpop.f32.mrf.mxu1 }
  0x87   :  { %v363_v49 = vadd.f32 %v300_v40, %v126_v39 }
  0x8b   :  { %v161_v41 = vpop.f32.mrf.mxu3 }
  0x8d   :  { %v509_v42 = vpop.f32.mrf.mxu2  ;;  %v128_v43 = vpop.f32.mrf.mxu0 }
  0x8e   :  { %v302_v44 = vpop.f32.mrf.mxu1 }
  0x8f   :  { %v364_v52 = vadd.f32 %v302_v44, %v128_v43 }
  0x93   :  { %v1091_v45 = vpop.f32.mrf.mxu3 }
  0x95   :  { %v510_v46 = vpop.f32.mrf.mxu2  ;;  %v131_v47 = vpop.f32.mrf.mxu0 }
  0x96   :  { %v305_v48 = vpop.f32.mrf.mxu1  ;;  %v570_v50 = vadd.f32 %v510_v46, %v363_v49 }
  0x97   :  { %v365_v3 = vadd.f32 %v305_v48, %v131_v47 }
  0x98   :  { %v624_v55 = vadd.f32 %v1096_v51, %v570_v50 }
  0x9a   :  { %v640_v60 = vmax.f32 %v624_v55, 0.0 }
  0x9b   :  { %v1098_v53 = vpop.f32.mrf.mxu3 }
  0x9d   :  { %v513_v54 = vpop.f32.mrf.mxu2  ;;  %v133_v57 = vpop.f32.mrf.mxu0 }
  0x9e   :  { %v571_v56 = vadd.f32 %v513_v54, %v364_v52  ;;  %v307_v58 = vpop.f32.mrf.mxu1 }
  0x9f   :  { %v366_v5 = vadd.f32 %v307_v58, %v133_v57 }
  0xa0   :  { %v625_v59 = vadd.f32 %v1096_v51, %v571_v56 }
  0xa2   :  { %v641_v61 = vmax.f32 %v625_v59, 0.0 }
  0xa3   :  { %v168_v63 = vpop.f32.mrf.mxu3 }
  0xa4   :  { %v894_v62 = vpack.c.bf16 %v641_v61, %v640_v60 }
  0xa5   :  { %v515_v0 = vpop.f32.mrf.mxu2  ;;  %v136_v1 = vpop.f32.mrf.mxu0 }
  0xa6   :  { %895 = vst [vmem:[%s1148_s3] sm:$0xff] %v894_v62   ;;  %v310_v2 = vpop.f32.mrf.mxu1  ;;  %v572_v4 = vadd.f32 %v515_v0, %v365_v3 }
  0xa7   :  { %v367_v21 = vadd.f32 %v310_v2, %v136_v1 }
  0xa8   :  { %v626_v9 = vadd.f32 %v1096_v51, %v572_v4 }
  0xaa   :  { %v642_v14 = vmax.f32 %v626_v9, 0.0 }
  0xab   :  { %v335_v6 = vpop.f32.mrf.mxu3 }
  0xac   :  { %v1105_v7 = vadd.f32 %v335_v6, %v161_v41 }
  0xad   :  { %v518_v8 = vpop.f32.mrf.mxu2  ;;  %v138_v11 = vpop.f32.mrf.mxu0 }
  0xae   :  { %v573_v10 = vadd.f32 %v518_v8, %v366_v5  ;;  %v312_v12 = vpop.f32.mrf.mxu1 }
  0xaf   :  { %v368_v23 = vadd.f32 %v312_v12, %v138_v11 }
  0xb0   :  { %v627_v13 = vadd.f32 %v1096_v51, %v573_v10 }
  0xb2   :  { %v643_v15 = vmax.f32 %v627_v13, 0.0 }
  0xb3   :  { %v337_v17 = vpop.f32.mrf.mxu3 }
  0xb4   :  { %v899_v16 = vpack.c.bf16 %v643_v15, %v642_v14  ;;  %v378_v61 = vadd.f32 %v337_v17, %v1091_v45 }
  0xb5   :  { %v520_v18 = vpop.f32.mrf.mxu2  ;;  %v141_v19 = vpop.f32.mrf.mxu0 }
  0xb6   :  { %931 = vst [vmem:[%s1148_s3 + $0x8] sm:$0xff] %v899_v16   ;;  %v315_v20 = vpop.f32.mrf.mxu1  ;;  %v574_v22 = vadd.f32 %v520_v18, %v367_v21 }
  0xb7   :  { %v369_v38 = vadd.f32 %v315_v20, %v141_v19 }
  0xb8   :  { %v628_v26 = vadd.f32 %v1096_v51, %v574_v22 }
  0xba   :  { %v644_v31 = vmax.f32 %v628_v26, 0.0 }
  0xbb   :  { %v340_v24 = vpop.f32.mrf.mxu3 }
  0xbc   :  { %v379_v2 = vadd.f32 %v340_v24, %v1098_v53 }
  0xbd   :  { %v523_v25 = vpop.f32.mrf.mxu2  ;;  %v143_v28 = vpop.f32.mrf.mxu0 }
  0xbe   :  { %v575_v27 = vadd.f32 %v523_v25, %v368_v23  ;;  %v317_v29 = vpop.f32.mrf.mxu1 }
  0xbf   :  { %v370_v40 = vadd.f32 %v317_v29, %v143_v28 }
  0xc0   :  { %v629_v30 = vadd.f32 %v1096_v51, %v575_v27 }
  0xc2   :  { %v645_v32 = vmax.f32 %v629_v30, 0.0 }
  0xc3   :  { %v342_v34 = vpop.f32.mrf.mxu3 }
  0xc4   :  { %v904_v33 = vpack.c.bf16 %v645_v32, %v644_v31 }
  0xc5   :  { %v525_v35 = vpop.f32.mrf.mxu2  ;;  %v146_v36 = vpop.f32.mrf.mxu0 }
  0xc6   :  { %932 = vst [vmem:[%s1148_s3 + $0x10] sm:$0xff] %v904_v33   ;;  %v320_v37 = vpop.f32.mrf.mxu1  ;;  %v576_v39 = vadd.f32 %v525_v35, %v369_v38 }
  0xc8   :  { %v630_v43 = vadd.f32 %v1096_v51, %v576_v39 }
  0xca   :  { %v646_v49 = vmax.f32 %v630_v43, 0.0 }
  0xcb   :  { %v543_v41 = vpop.f32.mrf.mxu3 }
  0xcd   :  { %v528_v42 = vpop.f32.mrf.mxu2  ;;  %v148_v46 = vpop.f32.mrf.mxu0 }
  0xce   :  { %v577_v44 = vadd.f32 %v528_v42, %v370_v40  ;;  %v322_v47 = vpop.f32.mrf.mxu1 }
  0xcf   :  { %v372_v63 = vadd.f32 %v322_v47, %v148_v46 }
  0xd0   :  { %v631_v48 = vadd.f32 %v1096_v51, %v577_v44 }
  0xd2   :  { %v647_v50 = vmax.f32 %v631_v48, 0.0 }
  0xd3   :  { %v545_v54 = vpop.f32.mrf.mxu3 }
  0xd4   :  { %v909_v52 = vpack.c.bf16 %v647_v50, %v646_v49  ;;  %v584_v20 = vadd.f32 %v545_v54, %v1105_v7 }
  0xd5   :  { %v530_v55 = vpop.f32.mrf.mxu2  ;;  %v151_v56 = vpop.f32.mrf.mxu0 }
  0xd6   :  { %933 = vst [vmem:[%s1148_s3 + $0x18] sm:$0xff] %v909_v52   ;;  %v325_v57 = vpop.f32.mrf.mxu1  ;;  %v637_v25 = vadd.f32 %v1096_v51, %v584_v20 }
  0xd7   :  { %v373_v3 = vadd.f32 %v325_v57, %v151_v56 }
  0xd8   :  { %v653_v31 = vmax.f32 %v637_v25, 0.0 }
  0xdb   :  { %v548_v58 = vpop.f32.mrf.mxu3 }
  0xdc   :  { %v585_v0 = vadd.f32 %v548_v58, %v378_v61 }
  0xdd   :  { %v533_v59 = vpop.f32.mrf.mxu2  ;;  %v153_v60 = vpop.f32.mrf.mxu0 }
  0xde   :  { %v327_v62 = vpop.f32.mrf.mxu1  ;;  %v579_v1 = vadd.f32 %v533_v59, %v372_v63  ;;  %v638_v5 = vadd.f32 %v1096_v51, %v585_v0 }
  0xdf   :  { %v374_v23 = vadd.f32 %v327_v62, %v153_v60 }
  0xe0   :  { %v632_v9 = vadd.f32 %v1096_v51, %v579_v1  ;;  %v654_v14 = vmax.f32 %v638_v5, 0.0 }
  0xe2   :  { %v648_v16 = vmax.f32 %v632_v9, 0.0 }
  0xe3   :  { %v550_v4 = vpop.f32.mrf.mxu3 }
  0xe4   :  { %v586_v8 = vadd.f32 %v550_v4, %v379_v2 }
  0xe5   :  { %v535_v6 = vpop.f32.mrf.mxu2  ;;  %v156_v11 = vpop.f32.mrf.mxu0 }
  0xe6   :  { %v580_v10 = vadd.f32 %v535_v6, %v373_v3  ;;  %v639_v12 = vadd.f32 %v1096_v51, %v586_v8  ;;  %v330_v13 = vpop.f32.mrf.mxu1 }
  0xe7   :  { %v375_v28 = vadd.f32 %v330_v13, %v156_v11 }
  0xe8   :  { %v633_v45 = vadd.f32 %v1096_v51, %v580_v10  ;;  %v655_v15 = vmax.f32 %v639_v12, 0.0 }
  0xea   :  { %v649_v17 = vmax.f32 %v633_v45, 0.0  ;;  %v929_v53 = vpack.c.bf16 %v655_v15, %v654_v14 }
  0xec   :  { %v914_v18 = vpack.c.bf16 %v649_v17, %v648_v16  ;;  %937 = vst [vmem:[%s1148_s3 + $0x38] sm:$0xff] %v929_v53  }
  0xed   :  { %v538_v19 = vpop.f32.mrf.mxu2  ;;  %v158_v21 = vpop.f32.mrf.mxu0 }
  0xee   :  { %934 = vst [vmem:[%s1148_s3 + $0x20] sm:$0xff] %v914_v18   ;;  %v332_v22 = vpop.f32.mrf.mxu1  ;;  %v581_v26 = vadd.f32 %v538_v19, %v374_v23 }
  0xef   :  { %v376_v24 = vadd.f32 %v332_v22, %v158_v21 }
  0xf0   :  { %v634_v32 = vadd.f32 %v1096_v51, %v581_v26 }
  0xf1   :  { %v583_v27 = vadd.f32 %v543_v41, %v376_v24 }
  0xf2   :  { %v650_v36 = vmax.f32 %v634_v32, 0.0 }
  0xf3   :  { %v636_v29 = vadd.f32 %v1096_v51, %v583_v27 }
  0xf5   :  { %v540_v30 = vpop.f32.mrf.mxu2  ;;  %v652_v7 = vmax.f32 %v636_v29, 0.0 }
  0xf6   :  { %v582_v33 = vadd.f32 %v540_v30, %v375_v28 }
  0xf7   :  { %v924_v34 = vpack.c.bf16 %v653_v31, %v652_v7 }
  0xf8   :  { %v635_v35 = vadd.f32 %v1096_v51, %v582_v33 }
  0xf9   :  { %936 = vst [vmem:[%s1148_s3 + $0x30] sm:$0xff] %v924_v34  }
  0xfa   :  { %v651_v37 = vmax.f32 %v635_v35, 0.0 }
  0xfc   :  { %v919_v38 = vpack.c.bf16 %v651_v37, %v650_v36 }
  0xfe   :  { %935 = vst [vmem:[%s1148_s3 + $0x28] sm:$0xff] %v919_v38  }

// kernel: basic_block_forward.5
= control target key start
LH: loop header
LB: loop body
LE: loop exit
PB: predicated region body
PF: predicated region fallthrough
CT: control target
= control target key end

     0   :  { %s3958_s0 = inlined_call_operand.vmem [shape: bf16[1,160,384], index: 0, kind: input, shape index: {}]   ;;  %s3959_s1 = inlined_call_operand.vmem [shape: bf16[3,384,128], index: 1, kind: input, shape index: {}]   ;;  %s3960_s2 = inlined_call_operand.vmem [shape: f32[1,128], index: 2, kind: input, shape index: {}]   ;;  %s3961_s3 = inlined_call_operand.vmem [shape: bf16[2,64,128], index: 3, kind: input, shape index: {}]   ;;  %s3962_s4 = inlined_call_operand.hbm [shape: f32[2,64,128], index: 4, kind: output, shape index: {}]  }
   0x1   :  { %v2764_v0 = vld [vmem:[%s3959_s1 + $0x38] sm:$0xff]  ;;  %v2763_v1 = vld [vmem:[%s3959_s1 + $0x30] sm:$0xff]  ;;  %v2762_v2 = vld [vmem:[%s3959_s1 + $0x28] sm:$0xff] }
   0x2   :  { %410 = vmatpush.bf16.msra.mxu0 %v2764_v0  ;;  %2928 = vmatpush.bf16.msra.mxu1 %v2764_v0 }
   0x3   :  { %2929 = vmatpush.bf16.msra.mxu2 %v2764_v0  ;;  %2930 = vmatpush.bf16.msra.mxu3 %v2764_v0 }
   0x6   :  { %411 = vmatpush.bf16.msra.mxu0 %v2763_v1  ;;  %2931 = vmatpush.bf16.msra.mxu1 %v2763_v1 }
   0x7   :  { %2932 = vmatpush.bf16.msra.mxu2 %v2763_v1  ;;  %2933 = vmatpush.bf16.msra.mxu3 %v2763_v1 }
   0x8   :  { %9 = vsyncpa [#allocation4], 0  ;;  %v2761_v3 = vld [vmem:[%s3959_s1 + $0x20] sm:$0xff]  ;;  %v2760_v4 = vld [vmem:[%s3959_s1 + $0x18] sm:$0xff]  ;;  %s1971_s10 = sshll.u32 %s3962_s4, 4  ;;  %s2983_s11 = smov 128   ;;  %s1972_s10 = int_to_ptr.hbm [resolvable:$true] %s1971_s10 }
   0x9   :  { %v2759_v5 = vld [vmem:[%s3959_s1 + $0x10] sm:$0xff]  ;;  %v2758_v6 = vld [vmem:[%s3959_s1 + $0x8] sm:$0xff]  ;;  %v2757_v7 = vld [vmem:[%s3959_s1] sm:$0xff]  ;;  %s2984_s12 = smov 8  }
   0xa   :  { %412 = vmatpush.bf16.msra.mxu0 %v2762_v2  ;;  %2934 = vmatpush.bf16.msra.mxu1 %v2762_v2  ;;  %v1985_v8 = vld [vmem:[%s3958_s0] sm:$0xf]  ;;  %v2728_v9 = vld [vmem:[%s3958_s0 + $0x8] sm:$0xf0]  ;;  %v2021_v10 = vld [vmem:[%s3958_s0 + $0x48] sm:$0xf] }
   0xb   :  { %2935 = vmatpush.bf16.msra.mxu2 %v2762_v2  ;;  %2936 = vmatpush.bf16.msra.mxu3 %v2762_v2  ;;  %v2737_v11 = vld [vmem:[%s3958_s0 + $0x50] sm:$0xf0]  ;;  %v2057_v12 = vld [vmem:[%s3958_s0 + $0x90] sm:$0xf]  ;;  %v2746_v13 = vld [vmem:[%s3958_s0 + $0x98] sm:$0xf0]  ;;  %v1986_v18 = vor.u32 %v2728_v9, %v1985_v8 }
   0xc   :  { %v2081_v14 = vld [vmem:[%s3958_s0 + $0xc0] sm:$0xf]  ;;  %v2752_v15 = vld [vmem:[%s3958_s0 + $0xc8] sm:$0xf0]  ;;  %v2826_v16 = vld [vmem:[%s3959_s1 + $0x138] sm:$0xff]  ;;  %v2022_v19 = vor.u32 %v2737_v11, %v2021_v10  ;;  %v2058_v20 = vor.u32 %v2746_v13, %v2057_v12 }
   0xd   :  { %v2780_v17 = vld [vmem:[%s3959_s1 + $0xb8] sm:$0xff]  ;;  %v2082_v21 = vor.u32 %v2752_v15, %v2081_v14  ;;  %v2779_v24 = vld [vmem:[%s3959_s1 + $0xb0] sm:$0xff]  ;;  %v2778_v28 = vld [vmem:[%s3959_s1 + $0xa8] sm:$0xff] }
   0xe   :  { %413 = vmatpush.bf16.msra.mxu0 %v2761_v3  ;;  %2937 = vmatpush.bf16.msra.mxu1 %v2761_v3  ;;  %v2818_v22 = vld [vmem:[%s3959_s1 + $0xf8] sm:$0xff]  ;;  %v2825_v25 = vld [vmem:[%s3959_s1 + $0x130] sm:$0xff]  ;;  %v2824_v29 = vld [vmem:[%s3959_s1 + $0x128] sm:$0xff] }
   0xf   :  { %2938 = vmatpush.bf16.msra.mxu2 %v2761_v3  ;;  %2939 = vmatpush.bf16.msra.mxu3 %v2761_v3  ;;  %v2772_v23 = vld [vmem:[%s3959_s1 + $0x78] sm:$0xff]  ;;  %v2817_v26 = vld [vmem:[%s3959_s1 + $0xf0] sm:$0xff]  ;;  %v2816_v30 = vld [vmem:[%s3959_s1 + $0xe8] sm:$0xff] }
  0x10   :  { %v2771_v27 = vld [vmem:[%s3959_s1 + $0x70] sm:$0xff]  ;;  %v2770_v31 = vld [vmem:[%s3959_s1 + $0x68] sm:$0xff]  ;;  %v2777_v32 = vld [vmem:[%s3959_s1 + $0xa0] sm:$0xff] }
  0x11   :  { %v2823_v33 = vld [vmem:[%s3959_s1 + $0x120] sm:$0xff]  ;;  %v1997_v35 = vld [vmem:[%s3958_s0 + $0x18] sm:$0xf]  ;;  %v2740_v38 = vld [vmem:[%s3958_s0 + $0x68] sm:$0xf0] }
  0x12   :  { %414 = vmatpush.bf16.msra.mxu0 %v2760_v4  ;;  %2940 = vmatpush.bf16.msra.mxu1 %v2760_v4  ;;  %v2815_v34 = vld [vmem:[%s3959_s1 + $0xe0] sm:$0xff]  ;;  %v2069_v39 = vld [vmem:[%s3958_s0 + $0xa8] sm:$0xf]  ;;  %v2749_v40 = vld [vmem:[%s3958_s0 + $0xb0] sm:$0xf0] }
  0x13   :  { %2941 = vmatpush.bf16.msra.mxu2 %v2760_v4  ;;  %2942 = vmatpush.bf16.msra.mxu3 %v2760_v4  ;;  %v2731_v36 = vld [vmem:[%s3958_s0 + $0x20] sm:$0xf0]  ;;  %v2033_v37 = vld [vmem:[%s3958_s0 + $0x60] sm:$0xf]  ;;  %v2093_v41 = vld [vmem:[%s3958_s0 + $0xd8] sm:$0xf]  ;;  %v2070_v48 = vor.u32 %v2749_v40, %v2069_v39 }
  0x14   :  { %v2755_v42 = vld [vmem:[%s3958_s0 + $0xe0] sm:$0xf0]  ;;  %v2776_v44 = vld [vmem:[%s3959_s1 + $0x98] sm:$0xff]  ;;  %v1998_v46 = vor.u32 %v2731_v36, %v1997_v35  ;;  %v2034_v47 = vor.u32 %v2740_v38, %v2033_v37  ;;  %v2775_v52 = vld [vmem:[%s3959_s1 + $0x90] sm:$0xff] }
  0x15   :  { %v2769_v43 = vld [vmem:[%s3959_s1 + $0x60] sm:$0xff]  ;;  %v2822_v45 = vld [vmem:[%s3959_s1 + $0x118] sm:$0xff]  ;;  %v2094_v49 = vor.u32 %v2755_v42, %v2093_v41  ;;  %v2821_v53 = vld [vmem:[%s3959_s1 + $0x110] sm:$0xff] }
  0x16   :  { %415 = vmatpush.bf16.msra.mxu0 %v2759_v5  ;;  %2943 = vmatpush.bf16.msra.mxu1 %v2759_v5  ;;  %v2814_v50 = vld [vmem:[%s3959_s1 + $0xd8] sm:$0xff]  ;;  %v2813_v54 = vld [vmem:[%s3959_s1 + $0xd0] sm:$0xff]  ;;  %v2774_v56 = vld [vmem:[%s3959_s1 + $0x88] sm:$0xff] }
  0x17   :  { %2944 = vmatpush.bf16.msra.mxu2 %v2759_v5  ;;  %2945 = vmatpush.bf16.msra.mxu3 %v2759_v5  ;;  %v2768_v51 = vld [vmem:[%s3959_s1 + $0x58] sm:$0xff]  ;;  %v2767_v55 = vld [vmem:[%s3959_s1 + $0x50] sm:$0xff]  ;;  %v2820_v57 = vld [vmem:[%s3959_s1 + $0x108] sm:$0xff] }
  0x18   :  { %v2812_v58 = vld [vmem:[%s3959_s1 + $0xc8] sm:$0xff]  ;;  %v2773_v59 = vld [vmem:[%s3959_s1 + $0x80] sm:$0xff]  ;;  %v2009_v61 = vld [vmem:[%s3958_s0 + $0x30] sm:$0xf] }
  0x19   :  { %v2766_v60 = vld [vmem:[%s3959_s1 + $0x48] sm:$0xff]  ;;  %v2734_v62 = vld [vmem:[%s3958_s0 + $0x38] sm:$0xf0]  ;;  %v2819_v63 = vld [vmem:[%s3959_s1 + $0x100] sm:$0xff] }
  0x1a   :  { %416 = vmatpush.bf16.msra.mxu0 %v2758_v6  ;;  %2946 = vmatpush.bf16.msra.mxu1 %v2758_v6  ;;  %v2811_v0 = vld [vmem:[%s3959_s1 + $0xc0] sm:$0xff]  ;;  %v2045_v1 = vld [vmem:[%s3958_s0 + $0x78] sm:$0xf]  ;;  %v1993_v5 = vld [vmem:[%s3958_s0 + $0x8] sm:$0xf]  ;;  %v2010_v12 = vor.u32 %v2734_v62, %v2009_v61 }
  0x1b   :  { %2947 = vmatpush.bf16.msra.mxu2 %v2758_v6  ;;  %2948 = vmatpush.bf16.msra.mxu3 %v2758_v6  ;;  %v2872_v2 = vld [vmem:[%s3959_s1 + $0x1b8] sm:$0xff]  ;;  %v2743_v4 = vld [vmem:[%s3958_s0 + $0x80] sm:$0xf0]  ;;  %v2729_v6 = vld [vmem:[%s3958_s0 + $0x10] sm:$0xf0] }
  0x1c   :  { %v2888_v3 = vld [vmem:[%s3959_s1 + $0x238] sm:$0xff]  ;;  %v2782_v8 = vld [vmem:[%s3958_s0 + $0x8] sm:$0xf0]  ;;  %v2765_v9 = vld [vmem:[%s3959_s1 + $0x40] sm:$0xff]  ;;  %v2046_v13 = vor.u32 %v2743_v4, %v2045_v1  ;;  %v1994_v14 = vor.u32 %v2729_v6, %v1993_v5 }
  0x1d   :  { %v2880_v10 = vld [vmem:[%s3959_s1 + $0x1f8] sm:$0xff]  ;;  %v2832_v35 = vld [vmem:[%s3959_s1 + $0x168] sm:$0xff]  ;;  %v2735_v41 = vld [vmem:[%s3958_s0 + $0x40] sm:$0xf0] }
  0x1e   :  { %417 = vmatpush.bf16.msra.mxu0 %v2757_v7  ;;  %2949 = vmatpush.bf16.msra.mxu1 %v2757_v7  ;;  %v2834_v11 = vld [vmem:[%s3959_s1 + $0x178] sm:$0xff]  ;;  %v1999_v37 = vld [vmem:[%s3958_s0 + $0x24] sm:$0xf0]  ;;  %v2273_v42 = vld [vmem:[%s3958_s0 + $0x30] sm:$0xf] }
  0x1f   :  { %2950 = vmatpush.bf16.msra.mxu2 %v2757_v7  ;;  %2951 = vmatpush.bf16.msra.mxu3 %v2757_v7  ;;  %v2249_v7 = vld [vmem:[%s3958_s0] sm:$0xf]  ;;  %v2730_v36 = vld [vmem:[%s3958_s0 + $0x1c] sm:$0xf]  ;;  %v2017_v38 = vld [vmem:[%s3958_s0 + $0x38] sm:$0xf] }
  0x20   :  { %v2250_v15 = vor.u32 %v2782_v8, %v2249_v7  ;;  %v2784_v39 = vld [vmem:[%s3958_s0 + $0x1c] sm:$0xf]  ;;  %v2263_v40 = vld [vmem:[%s3958_s0 + $0x24] sm:$0xf0]  ;;  %v2790_v5 = vld [vmem:[%s3958_s0 + $0x4c] sm:$0xf] }
  0x21   :  { %418 = vmatmul.bf16.vlgmr.msra.gmra.mxu0 %v1986_v18  ;;  %433 = vmatmul.bf16.vlgmr.msra.gmra.mxu1 %v2022_v19  ;;  %v2887_v18 = vld [vmem:[%s3959_s1 + $0x230] sm:$0xff]  ;;  %v2876_v1 = vld [vmem:[%s3959_s1 + $0x1d8] sm:$0xff]  ;;  %v2041_v4 = vld [vmem:[%s3958_s0 + $0x68] sm:$0xf] }
  0x22   :  { %1058 = vmatpush.bf16.msrb.mxu0 %v2826_v16  ;;  %448 = vmatmul.bf16.vlgmr.msra.gmra.mxu2 %v2058_v20  ;;  %v2871_v16 = vld [vmem:[%s3959_s1 + $0x1b0] sm:$0xff]  ;;  %v2727_v20 = vld [vmem:[%s3958_s0 + $0x4] sm:$0xf]  ;;  %v2287_v6 = vld [vmem:[%s3958_s0 + $0x54] sm:$0xf0] }
  0x23   :  { %528 = vmatpush.bf16.msrb.mxu2 %v2780_v17  ;;  %458 = vmatmul.bf16.vlgmr.msra.gmra.mxu3 %v2082_v21  ;;  %v2879_v17 = vld [vmem:[%s3959_s1 + $0x1f0] sm:$0xff]  ;;  %v2297_v8 = vld [vmem:[%s3958_s0 + $0x60] sm:$0xf] }
  0x24   :  { %1000 = vmatpush.bf16.msrb.mxu3 %v2818_v22  ;;  %469 = vmatpush.bf16.msrb.mxu1 %v2772_v23  ;;  %v2833_v19 = vld [vmem:[%s3959_s1 + $0x170] sm:$0xff]  ;;  %v2005_v22 = vld [vmem:[%s3958_s0 + $0x20] sm:$0xf]  ;;  %v2781_v23 = vld [vmem:[%s3958_s0 + $0x4] sm:$0xf] }
  0x25   :  { %v1987_v21 = vld [vmem:[%s3958_s0 + $0xc] sm:$0xf0]  ;;  %v2741_v7 = vld [vmem:[%s3958_s0 + $0x70] sm:$0xf0] }
  0x26   :  { %1059 = vmatpush.bf16.msrb.mxu0 %v2825_v25  ;;  %v2732_v25 = vld [vmem:[%s3958_s0 + $0x28] sm:$0xf0] }
  0x27   :  { %529 = vmatpush.bf16.msrb.mxu2 %v2779_v24  ;;  %v2251_v24 = vld [vmem:[%s3958_s0 + $0xc] sm:$0xf0] }
  0x28   :  { %1001 = vmatpush.bf16.msrb.mxu3 %v2817_v26  ;;  %470 = vmatpush.bf16.msrb.mxu1 %v2771_v27  ;;  %v2261_v26 = vld [vmem:[%s3958_s0 + $0x18] sm:$0xf]  ;;  %v2785_v27 = vld [vmem:[%s3958_s0 + $0x20] sm:$0xf0] }
  0x2a   :  { %1060 = vmatpush.bf16.msrb.mxu0 %v2824_v29  ;;  %v2254_v29 = vor.u32 %v2781_v23, %v2251_v24  ;;  %v2797_v23 = vld [vmem:[%s3958_s0 + $0x80] sm:$0xf0] }
  0x2b   :  { %530 = vmatpush.bf16.msrb.mxu2 %v2778_v28  ;;  %v1990_v28 = vor.u32 %v2727_v20, %v1987_v21  ;;  %v2299_v20 = vld [vmem:[%s3958_s0 + $0x6c] sm:$0xf0]  ;;  %v2744_v21 = vld [vmem:[%s3958_s0 + $0x88] sm:$0xf0] }
  0x2c   :  { %1002 = vmatpush.bf16.msrb.mxu3 %v2816_v30  ;;  %471 = vmatpush.bf16.msrb.mxu1 %v2770_v31  ;;  %v2006_v30 = vor.u32 %v2732_v25, %v2005_v22  ;;  %v2262_v31 = vor.u32 %v2785_v27, %v2261_v26  ;;  %v2309_v22 = vld [vmem:[%s3958_s0 + $0x78] sm:$0xf]  ;;  %v2867_v26 = vld [vmem:[%s3959_s1 + $0x190] sm:$0xff] }
  0x2d   :  { %v2875_v27 = vld [vmem:[%s3959_s1 + $0x1d0] sm:$0xff] }
  0x2e   :  { %1061 = vmatpush.bf16.msrb.mxu0 %v2823_v33  ;;  %v2878_v33 = vld [vmem:[%s3959_s1 + $0x1e8] sm:$0xff] }
  0x2f   :  { %531 = vmatpush.bf16.msrb.mxu2 %v2777_v32  ;;  %v2870_v32 = vld [vmem:[%s3959_s1 + $0x1a8] sm:$0xff] }
  0x30   :  { %1003 = vmatpush.bf16.msrb.mxu3 %v2815_v34  ;;  %472 = vmatpush.bf16.msrb.mxu1 %v2769_v43  ;;  %v2886_v34 = vld [vmem:[%s3959_s1 + $0x228] sm:$0xff]  ;;  %v2788_v43 = vld [vmem:[%s3958_s0 + $0x38] sm:$0xf0] }
  0x31   :  { %423 = vmatmul.bf16.gmra.mxu0 %v1998_v46  ;;  %438 = vmatmul.bf16.gmra.mxu1 %v2034_v47  ;;  %v2018_v46 = vor.u32 %v2735_v41, %v2017_v38  ;;  %v2274_v47 = vor.u32 %v2788_v43, %v2273_v42  ;;  %v2321_v38 = vld [vmem:[%s3958_s0 + $0x90] sm:$0xf] }
  0x32   :  { %1062 = vmatpush.bf16.msrb.mxu0 %v2822_v45  ;;  %453 = vmatmul.bf16.gmra.mxu2 %v2070_v48  ;;  %v2266_v45 = vor.u32 %v2784_v39, %v2263_v40  ;;  %v2869_v48 = vld [vmem:[%s3959_s1 + $0x1a0] sm:$0xff]  ;;  %v2800_v39 = vld [vmem:[%s3958_s0 + $0x98] sm:$0xf0] }
  0x33   :  { %532 = vmatpush.bf16.msrb.mxu2 %v2776_v44  ;;  %463 = vmatmul.bf16.gmra.mxu3 %v2094_v49  ;;  %v2002_v44 = vor.u32 %v2730_v36, %v1999_v37  ;;  %v2877_v49 = vld [vmem:[%s3959_s1 + $0x1e0] sm:$0xff]  ;;  %v2311_v36 = vld [vmem:[%s3958_s0 + $0x84] sm:$0xf0] }
  0x34   :  { %1004 = vmatpush.bf16.msrb.mxu3 %v2814_v50  ;;  %473 = vmatpush.bf16.msrb.mxu1 %v2768_v51  ;;  %v2885_v50 = vld [vmem:[%s3959_s1 + $0x220] sm:$0xff]  ;;  %v2733_v51 = vld [vmem:[%s3958_s0 + $0x34] sm:$0xf] }
  0x35   :  { %v2747_v37 = vld [vmem:[%s3958_s0 + $0xa0] sm:$0xf0] }
  0x36   :  { %1063 = vmatpush.bf16.msrb.mxu0 %v2821_v53  ;;  %v2029_v53 = vld [vmem:[%s3958_s0 + $0x50] sm:$0xf] }
  0x37   :  { %533 = vmatpush.bf16.msrb.mxu2 %v2775_v52  ;;  %v2011_v52 = vld [vmem:[%s3958_s0 + $0x3c] sm:$0xf0] }
  0x38   :  { %1005 = vmatpush.bf16.msrb.mxu3 %v2813_v54  ;;  %474 = vmatpush.bf16.msrb.mxu1 %v2767_v55  ;;  %v2787_v54 = vld [vmem:[%s3958_s0 + $0x34] sm:$0xf]  ;;  %v2275_v55 = vld [vmem:[%s3958_s0 + $0x3c] sm:$0xf0] }
  0x3a   :  { %1064 = vmatpush.bf16.msrb.mxu0 %v2820_v57  ;;  %v2285_v57 = vld [vmem:[%s3958_s0 + $0x48] sm:$0xf] }
  0x3b   :  { %534 = vmatpush.bf16.msrb.mxu2 %v2774_v56  ;;  %v2738_v56 = vld [vmem:[%s3958_s0 + $0x58] sm:$0xf0] }
  0x3c   :  { %1006 = vmatpush.bf16.msrb.mxu3 %v2812_v58  ;;  %475 = vmatpush.bf16.msrb.mxu1 %v2766_v60  ;;  %v2791_v58 = vld [vmem:[%s3958_s0 + $0x50] sm:$0xf0]  ;;  %v2278_v60 = vor.u32 %v2787_v54, %v2275_v55  ;;  %v2030_v61 = vor.u32 %v2738_v56, %v2029_v53  ;;  %v2059_v54 = vld [vmem:[%s3958_s0 + $0x9c] sm:$0xf0]  ;;  %v2077_v55 = vld [vmem:[%s3958_s0 + $0xb0] sm:$0xf] }
  0x3d   :  { %v2286_v62 = vor.u32 %v2791_v58, %v2285_v57  ;;  %v2745_v53 = vld [vmem:[%s3958_s0 + $0x94] sm:$0xf]  ;;  %v2323_v57 = vld [vmem:[%s3958_s0 + $0x9c] sm:$0xf0]  ;;  %v2750_v58 = vld [vmem:[%s3958_s0 + $0xb8] sm:$0xf0] }
  0x3e   :  { %1065 = vmatpush.bf16.msrb.mxu0 %v2819_v63  ;;  %v2831_v63 = vld [vmem:[%s3959_s1 + $0x160] sm:$0xff]  ;;  %v2799_v56 = vld [vmem:[%s3958_s0 + $0x94] sm:$0xf] }
  0x3f   :  { %535 = vmatpush.bf16.msrb.mxu2 %v2773_v59  ;;  %v2014_v59 = vor.u32 %v2733_v51, %v2011_v52  ;;  %v2882_v52 = vld [vmem:[%s3959_s1 + $0x208] sm:$0xff] }
  0x40   :  { %1007 = vmatpush.bf16.msrb.mxu3 %v2811_v0  ;;  %476 = vmatpush.bf16.msrb.mxu1 %v2765_v9  ;;  %v2868_v0 = vld [vmem:[%s3959_s1 + $0x198] sm:$0xff]  ;;  %v2794_v9 = vld [vmem:[%s3958_s0 + $0x68] sm:$0xf0] }
  0x41   :  { %428 = vmatmul.bf16.gmra.mxu0 %v2010_v12  ;;  %443 = vmatmul.bf16.gmra.mxu1 %v2046_v13  ;;  %v2042_v12 = vor.u32 %v2741_v7, %v2041_v4  ;;  %v2298_v13 = vor.u32 %v2794_v9, %v2297_v8  ;;  %v2865_v8 = vld [vmem:[%s3959_s1 + $0x180] sm:$0xff] }
  0x42   :  { %1738 = vmatpush.bf16.msra.mxu0 %v2888_v3  ;;  %536 = vmatmul.bf16.vlgmr.msrb.gmra.mxu2 %v1994_v14  ;;  %v2023_v3 = vld [vmem:[%s3958_s0 + $0x54] sm:$0xf0]  ;;  %v2873_v9 = vld [vmem:[%s3959_s1 + $0x1c0] sm:$0xff] }
  0x43   :  { %1624 = vmatpush.bf16.msra.mxu2 %v2872_v2  ;;  %1008 = vmatmul.bf16.vlgmr.msrb.gmra.mxu3 %v2250_v15  ;;  %v2736_v2 = vld [vmem:[%s3958_s0 + $0x4c] sm:$0xf]  ;;  %v2884_v14 = vld [vmem:[%s3959_s1 + $0x218] sm:$0xff] }
  0x44   :  { %1681 = vmatpush.bf16.msra.mxu3 %v2880_v10  ;;  %1116 = vmatpush.bf16.msra.mxu1 %v2834_v11  ;;  %v2026_v10 = vor.u32 %v2736_v2, %v2023_v3  ;;  %v2290_v11 = vor.u32 %v2790_v5, %v2287_v6  ;;  %v2830_v15 = vld [vmem:[%s3959_s1 + $0x158] sm:$0xff]  ;;  %v2078_v3 = vor.u32 %v2750_v58, %v2077_v55  ;;  %v2828_v5 = vld [vmem:[%s3959_s1 + $0x148] sm:$0xff] }
  0x46   :  { %1739 = vmatpush.bf16.msra.mxu0 %v2887_v18  ;;  %v2053_v18 = vld [vmem:[%s3958_s0 + $0x80] sm:$0xf] }
  0x47   :  { %1625 = vmatpush.bf16.msra.mxu2 %v2871_v16  ;;  %v2739_v16 = vld [vmem:[%s3958_s0 + $0x64] sm:$0xf] }
  0x48   :  { %1682 = vmatpush.bf16.msra.mxu3 %v2879_v17  ;;  %1117 = vmatpush.bf16.msra.mxu1 %v2833_v19  ;;  %v2035_v17 = vld [vmem:[%s3958_s0 + $0x6c] sm:$0xf0]  ;;  %v2793_v19 = vld [vmem:[%s3958_s0 + $0x64] sm:$0xf] }
  0x49   :  { %v2038_v24 = vor.u32 %v2739_v16, %v2035_v17  ;;  %v2302_v25 = vor.u32 %v2793_v19, %v2299_v20  ;;  %v2335_v16 = vld [vmem:[%s3958_s0 + $0xb4] sm:$0xf0]  ;;  %v2753_v17 = vld [vmem:[%s3958_s0 + $0xd0] sm:$0xf0]  ;;  %v2806_v19 = vld [vmem:[%s3958_s0 + $0xc8] sm:$0xf0] }
  0x4a   :  { %1740 = vmatpush.bf16.msra.mxu0 %v2886_v34  ;;  %v2065_v34 = vld [vmem:[%s3958_s0 + $0x98] sm:$0xf] }
  0x4b   :  { %1626 = vmatpush.bf16.msra.mxu2 %v2870_v32  ;;  %v2742_v32 = vld [vmem:[%s3958_s0 + $0x7c] sm:$0xf] }
  0x4c   :  { %1683 = vmatpush.bf16.msra.mxu3 %v2878_v33  ;;  %1118 = vmatpush.bf16.msra.mxu1 %v2832_v35  ;;  %v2047_v33 = vld [vmem:[%s3958_s0 + $0x84] sm:$0xf0]  ;;  %v2796_v35 = vld [vmem:[%s3958_s0 + $0x7c] sm:$0xf] }
  0x4d   :  { %v2050_v40 = vor.u32 %v2742_v32, %v2047_v33  ;;  %v2314_v41 = vor.u32 %v2796_v35, %v2311_v36  ;;  %v2083_v35 = vld [vmem:[%s3958_s0 + $0xcc] sm:$0xf0]  ;;  %v2101_v36 = vld [vmem:[%s3958_s0 + $0xe0] sm:$0xf] }
  0x4e   :  { %1741 = vmatpush.bf16.msra.mxu0 %v2885_v50 }
  0x4f   :  { %1627 = vmatpush.bf16.msra.mxu2 %v2869_v48 }
  0x50   :  { %1684 = vmatpush.bf16.msra.mxu3 %v2877_v49  ;;  %1119 = vmatpush.bf16.msra.mxu1 %v2831_v63  ;;  %v2062_v63 = vor.u32 %v2745_v53, %v2059_v54 }
  0x51   :  { %477 = vmatmul.bf16.vlgmr.msrb.gmra.mxu1 %v1990_v28  ;;  %1066 = vmatmul.bf16.vlgmr.msrb.gmra.mxu0 %v2254_v29  ;;  %v2054_v28 = vor.u32 %v2744_v21, %v2053_v18  ;;  %v2310_v29 = vor.u32 %v2797_v23, %v2309_v22  ;;  %v2345_v18 = vld [vmem:[%s3958_s0 + $0xc0] sm:$0xf] }
  0x52   :  { %541 = vmatmul.bf16.gmra.mxu2 %v2006_v30  ;;  %1742 = vmatpush.bf16.msra.mxu0 %v2884_v14  ;;  %v2883_v30 = vld [vmem:[%s3959_s1 + $0x210] sm:$0xff]  ;;  %v2089_v14 = vld [vmem:[%s3958_s0 + $0xc8] sm:$0xf] }
  0x53   :  { %1012 = vmatmul.bf16.gmra.mxu3 %v2262_v31  ;;  %1628 = vmatpush.bf16.msra.mxu2 %v2868_v0  ;;  %v2829_v31 = vld [vmem:[%s3959_s1 + $0x150] sm:$0xff]  ;;  %v2326_v0 = vor.u32 %v2799_v56, %v2323_v57 }
  0x54   :  { %1685 = vmatpush.bf16.msra.mxu3 %v2876_v1  ;;  %1120 = vmatpush.bf16.msra.mxu1 %v2830_v15  ;;  %v2802_v15 = vld [vmem:[%s3958_s0 + $0xac] sm:$0xf] }
  0x55   :  { %v2338_v23 = vor.u32 %v2802_v15, %v2335_v16 }
  0x56   :  { %1743 = vmatpush.bf16.msra.mxu0 %v2883_v30 }
  0x57   :  { %1629 = vmatpush.bf16.msra.mxu2 %v2867_v26 }
  0x58   :  { %1686 = vmatpush.bf16.msra.mxu3 %v2875_v27  ;;  %1121 = vmatpush.bf16.msra.mxu1 %v2829_v31  ;;  %v2090_v27 = vor.u32 %v2753_v17, %v2089_v14 }
  0x5a   :  { %1744 = vmatpush.bf16.msra.mxu0 %v2882_v52 }
  0x5c   :  { %1122 = vmatpush.bf16.msra.mxu1 %v2828_v5  ;;  %v2808_v5 = vld [vmem:[%s3958_s0 + $0xdc] sm:$0xf] }
  0x61   :  { %482 = vmatmul.bf16.gmra.mxu1 %v2002_v44  ;;  %1070 = vmatmul.bf16.gmra.mxu0 %v2266_v45  ;;  %v2066_v44 = vor.u32 %v2747_v37, %v2065_v34  ;;  %v2322_v45 = vor.u32 %v2800_v39, %v2321_v38  ;;  %v2751_v34 = vld [vmem:[%s3958_s0 + $0xc4] sm:$0xf]  ;;  %v2347_v38 = vld [vmem:[%s3958_s0 + $0xcc] sm:$0xf0]  ;;  %v2756_v39 = vld [vmem:[%s3958_s0 + $0xe8] sm:$0xf0] }
  0x62   :  { %546 = vmatmul.bf16.gmra.mxu2 %v2018_v46  ;;  %v2866_v46 = vld [vmem:[%s3959_s1 + $0x188] sm:$0xff]  ;;  %v2805_v37 = vld [vmem:[%s3958_s0 + $0xc4] sm:$0xf]  ;;  %v2102_v54 = vor.u32 %v2756_v39, %v2101_v36  ;;  %v2525_v36 = vld [vmem:[%s3958_s0 + $0x18] sm:$0xf] }
  0x63   :  { %1017 = vmatmul.bf16.gmra.mxu3 %v2274_v47  ;;  %v2874_v47 = vld [vmem:[%s3959_s1 + $0x1c8] sm:$0xff]  ;;  %1630 = vmatpush.bf16.msra.mxu2 %v2866_v46  ;;  %v2086_v46 = vor.u32 %v2751_v34, %v2083_v35  ;;  %v2783_v35 = vld [vmem:[%s3958_s0 + $0x10] sm:$0xf0]  ;;  %v2838_v39 = vld [vmem:[%s3958_s0 + $0x1c] sm:$0xf] }
  0x64   :  { %1687 = vmatpush.bf16.msra.mxu3 %v2874_v47  ;;  %v2350_v47 = vor.u32 %v2805_v37, %v2347_v38  ;;  %v2837_v37 = vld [vmem:[%s3958_s0 + $0x10] sm:$0xf0]  ;;  %v2839_v38 = vld [vmem:[%s3958_s0 + $0x20] sm:$0xf0] }
  0x67   :  { %1631 = vmatpush.bf16.msra.mxu2 %v2865_v8  ;;  %v2836_v8 = vld [vmem:[%s3958_s0 + $0x8] sm:$0xf0] }
  0x68   :  { %1688 = vmatpush.bf16.msra.mxu3 %v2873_v9  ;;  %v2835_v9 = vld [vmem:[%s3958_s0 + $0x4] sm:$0xf] }
  0x71   :  { %487 = vmatmul.bf16.gmra.mxu1 %v2014_v59  ;;  %1075 = vmatmul.bf16.gmra.mxu0 %v2278_v60  ;;  %v2333_v59 = vld [vmem:[%s3958_s0 + $0xa8] sm:$0xf]  ;;  %v2803_v60 = vld [vmem:[%s3958_s0 + $0xb0] sm:$0xf0] }
  0x72   :  { %551 = vmatmul.bf16.gmra.mxu2 %v2030_v61  ;;  %v2334_v4 = vor.u32 %v2803_v60, %v2333_v59 }
  0x73   :  { %1022 = vmatmul.bf16.gmra.mxu3 %v2286_v62 }
  0x81   :  { %492 = vmatmul.bf16.gmra.mxu1 %v2026_v10  ;;  %1080 = vmatmul.bf16.gmra.mxu0 %v2290_v11 }
  0x82   :  { %556 = vmatmul.bf16.gmra.mxu2 %v2042_v12  ;;  %v2748_v12 = vld [vmem:[%s3958_s0 + $0xac] sm:$0xf] }
  0x83   :  { %1027 = vmatmul.bf16.gmra.mxu3 %v2298_v13  ;;  %v2071_v13 = vld [vmem:[%s3958_s0 + $0xb4] sm:$0xf0] }
  0x84   :  { %v2074_v22 = vor.u32 %v2748_v12, %v2071_v13 }
  0x91   :  { %497 = vmatmul.bf16.gmra.mxu1 %v2038_v24  ;;  %1085 = vmatmul.bf16.gmra.mxu0 %v2302_v25  ;;  %v2881_v24 = vld [vmem:[%s3959_s1 + $0x200] sm:$0xff] }
  0x92   :  { %561 = vmatmul.bf16.gmra.mxu2 %v2054_v28  ;;  %v2346_v28 = vor.u32 %v2806_v19, %v2345_v18  ;;  %1745 = vmatpush.bf16.msra.mxu0 %v2881_v24 }
  0x93   :  { %1032 = vmatmul.bf16.gmra.mxu3 %v2310_v29  ;;  %v2827_v29 = vld [vmem:[%s3959_s1 + $0x140] sm:$0xff] }
  0x94   :  { %1123 = vmatpush.bf16.msra.mxu1 %v2827_v29 }
  0x9e   :  { %v3418_v42 = vpop.f32.mrf.mxu0  ;;  %v3420_v43 = vpop.f32.mrf.mxu1 }
  0xa1   :  { %502 = vmatmul.bf16.gmra.mxu1 %v2050_v40  ;;  %1090 = vmatmul.bf16.gmra.mxu0 %v2314_v41  ;;  %v2357_v40 = vld [vmem:[%s3958_s0 + $0xd8] sm:$0xf]  ;;  %v2809_v41 = vld [vmem:[%s3958_s0 + $0xe0] sm:$0xf0] }
  0xa2   :  { %566 = vmatmul.bf16.gmra.mxu2 %v2066_v44  ;;  %v2358_v55 = vor.u32 %v2809_v41, %v2357_v40  ;;  %v2527_v40 = vld [vmem:[%s3958_s0 + $0x24] sm:$0xf0] }
  0xa3   :  { %1037 = vmatmul.bf16.gmra.mxu3 %v2322_v45 }
  0xa5   :  { %v3428_v48 = vpop.f32.mrf.mxu2 }
  0xa6   :  { %v3430_v49 = vpop.f32.mrf.mxu3  ;;  %v3432_v50 = vpop.f32.mrf.mxu0 }
  0xa7   :  { %v3434_v51 = vpop.f32.mrf.mxu1 }
  0xad   :  { %v3463_v61 = vpop.f32.mrf.mxu2 }
  0xae   :  { %v3465_v62 = vpop.f32.mrf.mxu3  ;;  %v3467_v1 = vpop.f32.mrf.mxu0 }
  0xaf   :  { %v439_v2 = vpop.f32.mrf.mxu1 }
  0xb1   :  { %507 = vmatmul.bf16.gmra.mxu1 %v2062_v63  ;;  %1095 = vmatmul.bf16.gmra.mxu0 %v2326_v0 }
  0xb2   :  { %571 = vmatmul.bf16.gmra.mxu2 %v2078_v3 }
  0xb3   :  { %1042 = vmatmul.bf16.gmra.mxu3 %v2334_v4  ;;  %v2095_v4 = vld [vmem:[%s3958_s0 + $0xe4] sm:$0xf0] }
  0xb5   :  { %v3472_v6 = vpop.f32.mrf.mxu2 }
  0xb6   :  { %v464_v7 = vpop.f32.mrf.mxu3  ;;  %v3480_v10 = vpop.f32.mrf.mxu0 }
  0xb7   :  { %v441_v11 = vpop.f32.mrf.mxu1  ;;  %v2513_v7 = vld [vmem:[%s3958_s0] sm:$0xf] }
  0xb8   :  { %v2515_v11 = vld [vmem:[%s3958_s0 + $0xc] sm:$0xf0]  ;;  %v2514_v18 = vor.u32 %v2836_v8, %v2513_v7  ;;  %v2840_v8 = vld [vmem:[%s3958_s0 + $0x28] sm:$0xf0] }
  0xb9   :  { %v2518_v19 = vor.u32 %v2835_v9, %v2515_v11  ;;  %v2537_v7 = vld [vmem:[%s3958_s0 + $0x30] sm:$0xf]  ;;  %v2842_v9 = vld [vmem:[%s3958_s0 + $0x38] sm:$0xf0]  ;;  %v2841_v11 = vld [vmem:[%s3958_s0 + $0x34] sm:$0xf] }
  0xbd   :  { %v3506_v20 = vpop.f32.mrf.mxu2 }
  0xbe   :  { %v466_v21 = vpop.f32.mrf.mxu3  ;;  %v3511_v25 = vpop.f32.mrf.mxu0 }
  0xbf   :  { %v3513_v26 = vpop.f32.mrf.mxu1 }
  0xc1   :  { %512 = vmatmul.bf16.gmra.mxu1 %v2074_v22  ;;  %1100 = vmatmul.bf16.gmra.mxu0 %v2338_v23 }
  0xc2   :  { %576 = vmatmul.bf16.gmra.mxu2 %v2090_v27 }
  0xc3   :  { %1047 = vmatmul.bf16.gmra.mxu3 %v2346_v28 }
  0xc5   :  { %v537_v30 = vpop.f32.mrf.mxu2 }
  0xc6   :  { %v1009_v31 = vpop.f32.mrf.mxu3  ;;  %v3518_v32 = vpop.f32.mrf.mxu0 }
  0xc7   :  { %v3520_v33 = vpop.f32.mrf.mxu1 }
  0xcd   :  { %v539_v44 = vpop.f32.mrf.mxu2 }
  0xce   :  { %v1010_v45 = vpop.f32.mrf.mxu3  ;;  %v1067_v53 = vpop.f32.mrf.mxu0 }
  0xcf   :  { %v478_v52 = vpop.f32.mrf.mxu1  ;;  %v2526_v53 = vor.u32 %v2839_v38, %v2525_v36  ;;  %v2789_v38 = vld [vmem:[%s3958_s0 + $0x40] sm:$0xf0] }
  0xd0   :  { %v479_v56 = vadd.f32 %v478_v52, %v3418_v42  ;;  %v2754_v42 = vld [vmem:[%s3958_s0 + $0xdc] sm:$0xf] }
  0xd1   :  { %517 = vmatmul.bf16.gmra.mxu1 %v2086_v46  ;;  %1105 = vmatmul.bf16.gmra.mxu0 %v2350_v47  ;;  %v2098_v14 = vor.u32 %v2754_v42, %v2095_v4 }
  0xd2   :  { %v3547_v57 = vadd.f32 %v537_v30, %v479_v56  ;;  %581 = vmatmul.bf16.gmra.mxu2 %v2102_v54  ;;  %v2530_v54 = vor.u32 %v2838_v39, %v2527_v40  ;;  %v2549_v39 = vld [vmem:[%s3958_s0 + $0x48] sm:$0xf]  ;;  %v2843_v40 = vld [vmem:[%s3958_s0 + $0x40] sm:$0xf0] }
  0xd3   :  { %1052 = vmatmul.bf16.gmra.mxu3 %v2358_v55 }
  0xd5   :  { %v542_v58 = vpop.f32.mrf.mxu2 }
  0xd6   :  { %v1013_v59 = vpop.f32.mrf.mxu3  ;;  %v1068_v63 = vpop.f32.mrf.mxu0 }
  0xd7   :  { %v480_v60 = vpop.f32.mrf.mxu1  ;;  %v3550_v2 = vadd.f32 %v1068_v63, %v1010_v45 }
  0xd8   :  { %v481_v0 = vadd.f32 %v480_v60, %v3432_v50  ;;  %v2359_v50 = vld [vmem:[%s3958_s0 + $0xe4] sm:$0xf0] }
  0xd9   :  { %v2362_v15 = vor.u32 %v2808_v5, %v2359_v50  ;;  %v2786_v50 = vld [vmem:[%s3958_s0 + $0x28] sm:$0xf0] }
  0xda   :  { %v3552_v3 = vadd.f32 %v539_v44, %v481_v0 }
  0xdd   :  { %v544_v12 = vpop.f32.mrf.mxu2 }
  0xde   :  { %v1015_v13 = vpop.f32.mrf.mxu3  ;;  %v1071_v17 = vpop.f32.mrf.mxu0 }
  0xdf   :  { %v483_v16 = vpop.f32.mrf.mxu1  ;;  %v3579_v22 = vadd.f32 %v1071_v17, %v1013_v59 }
  0xe0   :  { %v484_v21 = vadd.f32 %v483_v16, %v3467_v1  ;;  %v2257_v1 = vld [vmem:[%s3958_s0 + $0x8] sm:$0xf] }
  0xe1   :  { %522 = vmatmul.bf16.gmra.mxu1 %v2098_v14  ;;  %1110 = vmatmul.bf16.gmra.mxu0 %v2362_v15  ;;  %v2258_v45 = vor.u32 %v2783_v35, %v2257_v1 }
  0xe2   :  { %v3581_v23 = vadd.f32 %v542_v58, %v484_v21  ;;  %1632 = vmatmul.bf16.vlgmr.msra.gmra.mxu2 %v2514_v18 }
  0xe3   :  { %1689 = vmatmul.bf16.vlgmr.msra.gmra.mxu3 %v2518_v19  ;;  %v2538_v19 = vor.u32 %v2842_v9, %v2537_v7  ;;  %v2293_v7 = vld [vmem:[%s3958_s0 + $0x50] sm:$0xf] }
  0xe4   :  { %v2557_v9 = vld [vmem:[%s3958_s0 + $0x50] sm:$0xf] }
  0xe5   :  { %v547_v24 = vpop.f32.mrf.mxu2 }
  0xe6   :  { %v1018_v27 = vpop.f32.mrf.mxu3  ;;  %v1073_v29 = vpop.f32.mrf.mxu0 }
  0xe7   :  { %v485_v28 = vpop.f32.mrf.mxu1  ;;  %v3584_v31 = vadd.f32 %v1073_v29, %v1015_v13 }
  0xe8   :  { %v486_v30 = vadd.f32 %v485_v28, %v3480_v10  ;;  %v2521_v10 = vld [vmem:[%s3958_s0 + $0x8] sm:$0xf] }
  0xe9   :  { %v2522_v46 = vor.u32 %v2837_v37, %v2521_v10 }
  0xea   :  { %v3586_v34 = vadd.f32 %v544_v12, %v486_v30  ;;  %v2539_v12 = vld [vmem:[%s3958_s0 + $0x3c] sm:$0xf0] }
  0xeb   :  { %v2542_v21 = vor.u32 %v2841_v11, %v2539_v12  ;;  %v2846_v11 = vld [vmem:[%s3958_s0 + $0x58] sm:$0xf0]  ;;  %v2848_v12 = vld [vmem:[%s3958_s0 + $0x68] sm:$0xf0] }
  0xed   :  { %v549_v41 = vpop.f32.mrf.mxu2 }
  0xee   :  { %v1020_v44 = vpop.f32.mrf.mxu3  ;;  %v1076_v52 = vpop.f32.mrf.mxu0 }
  0xef   :  { %v488_v47 = vpop.f32.mrf.mxu1  ;;  %v3613_v56 = vadd.f32 %v1076_v52, %v1018_v27 }
  0xf0   :  { %v489_v55 = vadd.f32 %v488_v47, %v3511_v25  ;;  %v2269_v25 = vld [vmem:[%s3958_s0 + $0x20] sm:$0xf] }
  0xf1   :  { %1124 = vmatmul.bf16.vlgmr.msra.gmra.mxu1 %v2258_v45  ;;  %1746 = vmatmul.bf16.vlgmr.msra.gmra.mxu0 %v2522_v46  ;;  %v2270_v15 = vor.u32 %v2786_v50, %v2269_v25  ;;  %v2551_v45 = vld [vmem:[%s3958_s0 + $0x54] sm:$0xf0] }
  0xf2   :  { %v3615_v58 = vadd.f32 %v547_v24, %v489_v55  ;;  %1635 = vmatmul.bf16.gmra.mxu2 %v2526_v53 }
  0xf3   :  { %1692 = vmatmul.bf16.gmra.mxu3 %v2530_v54 }
  0xf5   :  { %v552_v59 = vpop.f32.mrf.mxu2 }
  0xf6   :  { %v1023_v60 = vpop.f32.mrf.mxu3  ;;  %v1078_v0 = vpop.f32.mrf.mxu0 }
  0xf7   :  { %v490_v63 = vpop.f32.mrf.mxu1  ;;  %v3618_v4 = vadd.f32 %v1078_v0, %v1020_v44  ;;  %v2844_v44 = vld [vmem:[%s3958_s0 + $0x4c] sm:$0xf] }
  0xf8   :  { %v491_v42 = vadd.f32 %v490_v63, %v3518_v32  ;;  %v2533_v32 = vld [vmem:[%s3958_s0 + $0x20] sm:$0xf] }
  0xf9   :  { %v2534_v16 = vor.u32 %v2840_v8, %v2533_v32  ;;  %v2792_v32 = vld [vmem:[%s3958_s0 + $0x58] sm:$0xf0]  ;;  %v2561_v8 = vld [vmem:[%s3958_s0 + $0x60] sm:$0xf] }
  0xfa   :  { %v3620_v5 = vadd.f32 %v549_v41, %v491_v42  ;;  %v2845_v41 = vld [vmem:[%s3958_s0 + $0x50] sm:$0xf0] }
  0xfd   :  { %v554_v13 = vpop.f32.mrf.mxu2 }
  0xfe   :  { %v1025_v14 = vpop.f32.mrf.mxu3  ;;  %v1081_v18 = vpop.f32.mrf.mxu0 }
  0xff   :  { %v493_v17 = vpop.f32.mrf.mxu1  ;;  %v3647_v27 = vadd.f32 %v1081_v18, %v1023_v60  ;;  %v2554_v60 = vor.u32 %v2844_v44, %v2551_v45  ;;  %v2558_v18 = vor.u32 %v2846_v11, %v2557_v9  ;;  %v2573_v44 = vld [vmem:[%s3958_s0 + $0x78] sm:$0xf]  ;;  %v2849_v45 = vld [vmem:[%s3958_s0 + $0x70] sm:$0xf0] }
 0x100   :  { %v494_v24 = vadd.f32 %v493_v17, %v3420_v43  ;;  %v2281_v43 = vld [vmem:[%s3958_s0 + $0x38] sm:$0xf]  ;;  %v2294_v17 = vor.u32 %v2792_v32, %v2293_v7 }
 0x101   :  { %1128 = vmatmul.bf16.gmra.mxu1 %v2270_v15  ;;  %1749 = vmatmul.bf16.gmra.mxu0 %v2534_v16  ;;  %v2282_v52 = vor.u32 %v2789_v38, %v2281_v43 }
 0x102   :  { %v3649_v28 = vadd.f32 %v552_v59, %v494_v24  ;;  %1640 = vmatmul.bf16.gmra.mxu2 %v2538_v19  ;;  %v2550_v59 = vor.u32 %v2845_v41, %v2549_v39  ;;  %v2562_v24 = vor.u32 %v2848_v12, %v2561_v8  ;;  %v2795_v41 = vld [vmem:[%s3958_s0 + $0x70] sm:$0xf0] }
 0x103   :  { %1697 = vmatmul.bf16.gmra.mxu3 %v2542_v21 }
 0x105   :  { %v557_v29 = vpop.f32.mrf.mxu2 }
 0x106   :  { %v1028_v30 = vpop.f32.mrf.mxu3  ;;  %v1083_v35 = vpop.f32.mrf.mxu0 }
 0x107   :  { %v495_v1 = vpop.f32.mrf.mxu1  ;;  %v3652_v10 = vadd.f32 %v1083_v35, %v1025_v14  ;;  %v2563_v14 = vld [vmem:[%s3958_s0 + $0x6c] sm:$0xf0] }
 0x108   :  { %v496_v36 = vadd.f32 %v495_v1, %v3434_v51  ;;  %v2545_v51 = vld [vmem:[%s3958_s0 + $0x38] sm:$0xf] }
 0x109   :  { %v2546_v53 = vor.u32 %v2843_v40, %v2545_v51 }
 0x10a   :  { %v3654_v37 = vadd.f32 %v554_v13, %v496_v36  ;;  %v2847_v13 = vld [vmem:[%s3958_s0 + $0x64] sm:$0xf] }
 0x10b   :  { %v2566_v29 = vor.u32 %v2847_v13, %v2563_v14 }
 0x10d   :  { %v559_v46 = vpop.f32.mrf.mxu2 }
 0x10e   :  { %v1030_v47 = vpop.f32.mrf.mxu3  ;;  %v1086_v55 = vpop.f32.mrf.mxu0  ;;  %v2851_v46 = vld [vmem:[%s3958_s0 + $0x80] sm:$0xf0] }
 0x10f   :  { %v498_v54 = vpop.f32.mrf.mxu1  ;;  %v3680_v63 = vadd.f32 %v1086_v55, %v1028_v30  ;;  %v2850_v47 = vld [vmem:[%s3958_s0 + $0x7c] sm:$0xf] }
 0x111   :  { %1133 = vmatmul.bf16.gmra.mxu1 %v2282_v52  ;;  %1754 = vmatmul.bf16.gmra.mxu0 %v2546_v53  ;;  %v2575_v52 = vld [vmem:[%s3958_s0 + $0x84] sm:$0xf0] }
 0x112   :  { %1645 = vmatmul.bf16.gmra.mxu2 %v2550_v59 }
 0x113   :  { %1702 = vmatmul.bf16.gmra.mxu3 %v2554_v60 }
 0x115   :  { %v562_v0 = vpop.f32.mrf.mxu2 }
 0x116   :  { %v1033_v42 = vpop.f32.mrf.mxu3  ;;  %v1088_v50 = vpop.f32.mrf.mxu0 }
 0x117   :  { %v500_v25 = vpop.f32.mrf.mxu1  ;;  %v2574_v42 = vor.u32 %v2851_v46, %v2573_v44 }
 0x118   :  { %v2578_v25 = vor.u32 %v2850_v47, %v2575_v52 }
 0x11d   :  { %v564_v15 = vpop.f32.mrf.mxu2 }
 0x11e   :  { %v1035_v16 = vpop.f32.mrf.mxu3  ;;  %v1091_v21 = vpop.f32.mrf.mxu0 }
 0x11f   :  { %v503_v19 = vpop.f32.mrf.mxu1  ;;  %v2853_v21 = vld [vmem:[%s3958_s0 + $0x94] sm:$0xf] }
 0x120   :  { %v504_v30 = vadd.f32 %v503_v19, %v3513_v26  ;;  %v2305_v26 = vld [vmem:[%s3958_s0 + $0x68] sm:$0xf]  ;;  %v2854_v19 = vld [vmem:[%s3958_s0 + $0x98] sm:$0xf0] }
 0x121   :  { %1138 = vmatmul.bf16.gmra.mxu1 %v2294_v17  ;;  %1759 = vmatmul.bf16.gmra.mxu0 %v2558_v18  ;;  %v2306_v55 = vor.u32 %v2795_v41, %v2305_v26  ;;  %v2585_v17 = vld [vmem:[%s3958_s0 + $0x90] sm:$0xf]  ;;  %v2852_v18 = vld [vmem:[%s3958_s0 + $0x88] sm:$0xf0] }
 0x122   :  { %v3707_v1 = vadd.f32 %v562_v0, %v504_v30  ;;  %1650 = vmatmul.bf16.gmra.mxu2 %v2562_v24  ;;  %v2587_v24 = vld [vmem:[%s3958_s0 + $0x9c] sm:$0xf0] }
 0x123   :  { %1707 = vmatmul.bf16.gmra.mxu3 %v2566_v29  ;;  %v2590_v26 = vor.u32 %v2853_v21, %v2587_v24 }
 0x125   :  { %v567_v35 = vpop.f32.mrf.mxu2 }
 0x126   :  { %v1038_v36 = vpop.f32.mrf.mxu3  ;;  %v1093_v38 = vpop.f32.mrf.mxu0 }
 0x127   :  { %v505_v43 = vpop.f32.mrf.mxu1  ;;  %v3710_v51 = vadd.f32 %v1093_v38, %v1035_v16  ;;  %v2798_v16 = vld [vmem:[%s3958_s0 + $0x88] sm:$0xf0] }
 0x128   :  { %v506_v39 = vadd.f32 %v505_v43, %v3520_v33  ;;  %v2569_v33 = vld [vmem:[%s3958_s0 + $0x68] sm:$0xf] }
 0x129   :  { %v2570_v59 = vor.u32 %v2849_v45, %v2569_v33 }
 0x12a   :  { %v3712_v40 = vadd.f32 %v564_v15, %v506_v39  ;;  %v2586_v39 = vor.u32 %v2854_v19, %v2585_v17 }
 0x12d   :  { %v569_v53 = vpop.f32.mrf.mxu2 }
 0x12e   :  { %v1040_v54 = vpop.f32.mrf.mxu3  ;;  %v1096_v0 = vpop.f32.mrf.mxu0 }
 0x12f   :  { %v508_v60 = vpop.f32.mrf.mxu1  ;;  %v3739_v7 = vadd.f32 %v1096_v0, %v1038_v36  ;;  %v2855_v0 = vld [vmem:[%s3958_s0 + $0xa0] sm:$0xf0] }
 0x130   :  { %v509_v50 = vadd.f32 %v508_v60, %v3428_v48  ;;  %v2317_v48 = vld [vmem:[%s3958_s0 + $0x80] sm:$0xf]  ;;  %v2597_v60 = vld [vmem:[%s3958_s0 + $0xa8] sm:$0xf] }
 0x131   :  { %1143 = vmatmul.bf16.gmra.mxu1 %v2306_v55  ;;  %1764 = vmatmul.bf16.gmra.mxu0 %v2570_v59  ;;  %v2801_v59 = vld [vmem:[%s3958_s0 + $0xa0] sm:$0xf0] }
 0x132   :  { %v3741_v32 = vadd.f32 %v567_v35, %v509_v50  ;;  %1655 = vmatmul.bf16.gmra.mxu2 %v2574_v42  ;;  %v2318_v35 = vor.u32 %v2798_v16, %v2317_v48  ;;  %v2857_v42 = vld [vmem:[%s3958_s0 + $0xb0] sm:$0xf0]  ;;  %v2599_v50 = vld [vmem:[%s3958_s0 + $0xb4] sm:$0xf0] }
 0x133   :  { %1712 = vmatmul.bf16.gmra.mxu3 %v2578_v25  ;;  %v2856_v25 = vld [vmem:[%s3958_s0 + $0xac] sm:$0xf]  ;;  %v2598_v16 = vor.u32 %v2857_v42, %v2597_v60 }
 0x134   :  { %v2602_v17 = vor.u32 %v2856_v25, %v2599_v50 }
 0x135   :  { %v572_v8 = vpop.f32.mrf.mxu2 }
 0x136   :  { %v1043_v9 = vpop.f32.mrf.mxu3  ;;  %v1098_v12 = vpop.f32.mrf.mxu0 }
 0x137   :  { %v510_v11 = vpop.f32.mrf.mxu1  ;;  %v3744_v14 = vadd.f32 %v1098_v12, %v1040_v54 }
 0x138   :  { %v511_v13 = vadd.f32 %v510_v11, %v3463_v61  ;;  %v2581_v61 = vld [vmem:[%s3958_s0 + $0x80] sm:$0xf] }
 0x139   :  { %v2582_v36 = vor.u32 %v2852_v18, %v2581_v61 }
 0x13a   :  { %v3746_v15 = vadd.f32 %v569_v53, %v511_v13 }
 0x13d   :  { %v574_v29 = vpop.f32.mrf.mxu2 }
 0x13e   :  { %v1045_v30 = vpop.f32.mrf.mxu3  ;;  %v1101_v38 = vpop.f32.mrf.mxu0 }
 0x13f   :  { %v513_v43 = vpop.f32.mrf.mxu1  ;;  %v3773_v44 = vadd.f32 %v1101_v38, %v1043_v9  ;;  %v2804_v38 = vld [vmem:[%s3958_s0 + $0xb8] sm:$0xf0] }
 0x140   :  { %v514_v41 = vadd.f32 %v513_v43, %v3472_v6  ;;  %v2329_v6 = vld [vmem:[%s3958_s0 + $0x98] sm:$0xf] }
 0x141   :  { %1148 = vmatmul.bf16.gmra.mxu1 %v2318_v35  ;;  %1769 = vmatmul.bf16.gmra.mxu0 %v2582_v36  ;;  %v2330_v11 = vor.u32 %v2801_v59, %v2329_v6 }
 0x142   :  { %v3775_v33 = vadd.f32 %v572_v8, %v514_v41  ;;  %1660 = vmatmul.bf16.gmra.mxu2 %v2586_v39  ;;  %v2609_v39 = vld [vmem:[%s3958_s0 + $0xc0] sm:$0xf]  ;;  %v2860_v41 = vld [vmem:[%s3958_s0 + $0xc8] sm:$0xf0] }
 0x143   :  { %1717 = vmatmul.bf16.gmra.mxu3 %v2590_v26  ;;  %v2858_v26 = vld [vmem:[%s3958_s0 + $0xb8] sm:$0xf0] }
 0x145   :  { %v577_v45 = vpop.f32.mrf.mxu2 }
 0x146   :  { %v1048_v46 = vpop.f32.mrf.mxu3  ;;  %v1103_v52 = vpop.f32.mrf.mxu0 }
 0x147   :  { %v515_v47 = vpop.f32.mrf.mxu1  ;;  %v3778_v54 = vadd.f32 %v1103_v52, %v1045_v30 }
 0x148   :  { %v516_v53 = vadd.f32 %v515_v47, %v3506_v20  ;;  %v2593_v20 = vld [vmem:[%s3958_s0 + $0x98] sm:$0xf] }
 0x149   :  { %v2594_v12 = vor.u32 %v2855_v0, %v2593_v20  ;;  %v2610_v20 = vor.u32 %v2860_v41, %v2609_v39 }
 0x14a   :  { %v3780_v55 = vadd.f32 %v574_v29, %v516_v53 }
 0x14d   :  { %v579_v8 = vpop.f32.mrf.mxu2 }
 0x14e   :  { %v1050_v9 = vpop.f32.mrf.mxu3  ;;  %v1106_v48 = vpop.f32.mrf.mxu0 }
 0x14f   :  { %v518_v13 = vpop.f32.mrf.mxu1  ;;  %v3807_v18 = vadd.f32 %v1106_v48, %v1048_v46  ;;  %v2611_v46 = vld [vmem:[%s3958_s0 + $0xcc] sm:$0xf0]  ;;  %v2617_v48 = vld [vmem:[%s3958_s0 + $0xc8] sm:$0xf] }
 0x150   :  { %v519_v61 = vadd.f32 %v518_v13, %v3430_v49  ;;  %v2341_v49 = vld [vmem:[%s3958_s0 + $0xb0] sm:$0xf]  ;;  %v2621_v13 = vld [vmem:[%s3958_s0 + $0xd8] sm:$0xf] }
 0x151   :  { %1153 = vmatmul.bf16.gmra.mxu1 %v2330_v11  ;;  %1774 = vmatmul.bf16.gmra.mxu0 %v2594_v12  ;;  %v2342_v53 = vor.u32 %v2804_v38, %v2341_v49  ;;  %v2353_v11 = vld [vmem:[%s3958_s0 + $0xc8] sm:$0xf]  ;;  %v2807_v12 = vld [vmem:[%s3958_s0 + $0xd0] sm:$0xf0] }
 0x152   :  { %v3809_v19 = vadd.f32 %v577_v45, %v519_v61  ;;  %1665 = vmatmul.bf16.gmra.mxu2 %v2598_v16  ;;  %v2859_v45 = vld [vmem:[%s3958_s0 + $0xc4] sm:$0xf]  ;;  %v2861_v16 = vld [vmem:[%s3958_s0 + $0xd0] sm:$0xf0]  ;;  %v2862_v61 = vld [vmem:[%s3958_s0 + $0xdc] sm:$0xf] }
 0x153   :  { %1722 = vmatmul.bf16.gmra.mxu3 %v2602_v17  ;;  %v2614_v0 = vor.u32 %v2859_v45, %v2611_v46  ;;  %v2863_v17 = vld [vmem:[%s3958_s0 + $0xe0] sm:$0xf0] }
 0x154   :  { %v2622_v39 = vor.u32 %v2863_v17, %v2621_v13  ;;  %v3887_v13 = vld [vmem:[%s3960_s2] ss:$0 sm:$0xff] }
 0x155   :  { %v582_v21 = vpop.f32.mrf.mxu2 }
 0x156   :  { %v1053_v24 = vpop.f32.mrf.mxu3  ;;  %v1108_v30 = vpop.f32.mrf.mxu0  ;;  %v2623_v21 = vld [vmem:[%s3958_s0 + $0xe4] sm:$0xf0] }
 0x157   :  { %v520_v29 = vpop.f32.mrf.mxu1  ;;  %v3812_v36 = vadd.f32 %v1108_v30, %v1050_v9  ;;  %v2354_v30 = vor.u32 %v2807_v12, %v2353_v11 }
 0x158   :  { %v521_v35 = vadd.f32 %v520_v29, %v3465_v62  ;;  %v2605_v62 = vld [vmem:[%s3958_s0 + $0xb0] sm:$0xf] }
 0x159   :  { %v2606_v6 = vor.u32 %v2858_v26, %v2605_v62  ;;  %v2626_v62 = vor.u32 %v2862_v61, %v2623_v21 }
 0x15a   :  { %v3814_v43 = vadd.f32 %v579_v8, %v521_v35  ;;  %v2618_v35 = vor.u32 %v2861_v16, %v2617_v48 }
 0x15d   :  { %v584_v47 = vpop.f32.mrf.mxu2 }
 0x15e   :  { %v1055_v52 = vpop.f32.mrf.mxu3  ;;  %v1111_v60 = vpop.f32.mrf.mxu0 }
 0x15f   :  { %v523_v59 = vpop.f32.mrf.mxu1  ;;  %v3840_v42 = vadd.f32 %v1111_v60, %v1053_v24  ;;  %v2864_v60 = vld [vmem:[%s3958_s0 + $0xe8] sm:$0xf0] }
 0x160   :  { %v2629_v59 = vld [vmem:[%s3958_s0 + $0xe0] sm:$0xf] }
 0x161   :  { %1158 = vmatmul.bf16.gmra.mxu1 %v2342_v53  ;;  %1779 = vmatmul.bf16.gmra.mxu0 %v2606_v6  ;;  %v2365_v53 = vld [vmem:[%s3958_s0 + $0xe0] sm:$0xf]  ;;  %v2810_v6 = vld [vmem:[%s3958_s0 + $0xe8] sm:$0xf0] }
 0x162   :  { %1670 = vmatmul.bf16.gmra.mxu2 %v2610_v20 }
 0x163   :  { %1727 = vmatmul.bf16.gmra.mxu3 %v2614_v0 }
 0x165   :  { %v1633_v25 = vpop.f32.mrf.mxu2 }
 0x166   :  { %v1690_v50 = vpop.f32.mrf.mxu3  ;;  %v1113_v9 = vpop.f32.mrf.mxu0  ;;  %v2630_v25 = vor.u32 %v2864_v60, %v2629_v59  ;;  %v2921_v59 = vld [vmem:[%s3961_s3 + $0x8] sm:$0xff]  }
 0x167   :  { %v525_v8 = vpop.f32.mrf.mxu1  ;;  %v2890_v9 = vld [vmem:[%s3961_s3] sm:$0xff]  }
 0x168   :  { %v2891_v17 = vunpack.c.l.bf16 %v2890_v9 }
 0x16d   :  { %v1634_v24 = vpop.f32.mrf.mxu2 }
 0x16e   :  { %v1691_v29 = vpop.f32.mrf.mxu3  ;;  %v1747_v38 = vpop.f32.mrf.mxu0 }
 0x16f   :  { %v1125_v49 = vpop.f32.mrf.mxu1 }
 0x171   :  { %1163 = vmatmul.bf16.gmra.mxu1 %v2354_v30  ;;  %1784 = vmatmul.bf16.gmra.mxu0 %v2618_v35 }
 0x172   :  { %1675 = vmatmul.bf16.gmra.mxu2 %v2622_v39 }
 0x173   :  { %1732 = vmatmul.bf16.gmra.mxu3 %v2626_v62 }
 0x175   :  { %v1636_v26 = vpop.f32.mrf.mxu2 }
 0x176   :  { %v1693_v41 = vpop.f32.mrf.mxu3  ;;  %v1748_v46 = vpop.f32.mrf.mxu0 }
 0x177   :  { %v1126_v45 = vpop.f32.mrf.mxu1  ;;  %v1694_v20 = vadd.f32 %v1693_v41, %v1636_v26  ;;  %v2892_v26 = vunpack.c.h.bf16 %v2890_v9 }
 0x178   :  { %v1127_v47 = vadd.f32 %v1126_v45, %v3550_v2 }
 0x17a   :  { %v1193_v52 = vadd.f32 %v1127_v47, %v3547_v57  ;;  %v2366_v57 = vor.u32 %v2810_v6, %v2365_v53 }
 0x17d   :  { %v1638_v2 = vpop.f32.mrf.mxu2 }
 0x17e   :  { %v1695_v0 = vpop.f32.mrf.mxu3  ;;  %v1750_v8 = vpop.f32.mrf.mxu0 }
 0x17f   :  { %v1129_v50 = vpop.f32.mrf.mxu1  ;;  %v1751_v12 = vadd.f32 %v1750_v8, %v1694_v20  ;;  %v1696_v21 = vadd.f32 %v1695_v0, %v1638_v2  ;;  %v2895_v0 = vunpack.c.l.bf16 %v2921_v59 }
 0x180   :  { %v1130_v11 = vadd.f32 %v1129_v50, %v3579_v22 }
 0x181   :  { %v1813_v16 = vadd.f32 %v1751_v12, %v1193_v52  ;;  %1168 = vmatmul.bf16.gmra.mxu1 %v2366_v57  ;;  %1789 = vmatmul.bf16.gmra.mxu0 %v2630_v25 }
 0x182   :  { %v1194_v48 = vadd.f32 %v1130_v11, %v3552_v3 }
 0x183   :  { %v1869_v61 = vadd.f32 %v3887_v13, %v1813_v16 }
 0x185   :  { %v1917_v24 = vadd.f32 %v2891_v17, %v1869_v61  ;;  %v1641_v29 = vpop.f32.mrf.mxu2 }
 0x186   :  { %v1698_v30 = vpop.f32.mrf.mxu3  ;;  %v1752_v22 = vpop.f32.mrf.mxu0 }
 0x187   :  { %v1131_v35 = vpop.f32.mrf.mxu1  ;;  %v1933_v49 = vmax.f32 %v1917_v24, 0.0  ;;  %v1753_v39 = vadd.f32 %v1752_v22, %v1696_v21  ;;  %v1699_v41 = vadd.f32 %v1698_v30, %v1641_v29  ;;  %v2896_v21 = vunpack.c.h.bf16 %v2921_v59 }
 0x188   :  { %v1132_v38 = vadd.f32 %v1131_v35, %v3584_v31 }
 0x189   :  { %1949 = vst [vmem:[#allocation3] sm:$0xff] %v1933_v49  ;;  %v1814_v3 = vadd.f32 %v1753_v39, %v1194_v48 }
 0x18a   :  { %v1195_v62 = vadd.f32 %v1132_v38, %v3581_v23  ;;  %v2922_v38 = vld [vmem:[%s3961_s3 + $0x10] sm:$0xff]  }
 0x18b   :  { %v1870_v45 = vadd.f32 %v3887_v13, %v1814_v3 }
 0x18d   :  { %v1918_v46 = vadd.f32 %v2892_v26, %v1870_v45  ;;  %v1643_v47 = vpop.f32.mrf.mxu2  ;;  %v2899_v26 = vunpack.c.l.bf16 %v2922_v38 }
 0x18e   :  { %v1700_v52 = vpop.f32.mrf.mxu3  ;;  %v1755_v6 = vpop.f32.mrf.mxu0 }
 0x18f   :  { %v1134_v53 = vpop.f32.mrf.mxu1  ;;  %v1934_v60 = vmax.f32 %v1918_v46, 0.0  ;;  %v1756_v20 = vadd.f32 %v1755_v6, %v1699_v41  ;;  %v1701_v25 = vadd.f32 %v1700_v52, %v1643_v47 }
 0x190   :  { %v1135_v31 = vadd.f32 %v1134_v53, %v3613_v56 }
 0x191   :  { %1950 = vst [vmem:[#allocation3 + $0x8] sm:$0xff] %v1934_v60  ;;  %v1815_v2 = vadd.f32 %v1756_v20, %v1195_v62 }
 0x192   :  { %v1196_v23 = vadd.f32 %v1135_v31, %v3586_v34 }
 0x193   :  { %v1871_v57 = vadd.f32 %v3887_v13, %v1815_v2 }
 0x195   :  { %v1919_v50 = vadd.f32 %v2895_v0, %v1871_v57  ;;  %v1646_v8 = vpop.f32.mrf.mxu2 }
 0x196   :  { %v1703_v9 = vpop.f32.mrf.mxu3  ;;  %v1757_v12 = vpop.f32.mrf.mxu0 }
 0x197   :  { %v1136_v11 = vpop.f32.mrf.mxu1  ;;  %v1935_v48 = vmax.f32 %v1919_v50, 0.0  ;;  %v1758_v17 = vadd.f32 %v1757_v12, %v1701_v25  ;;  %v1704_v34 = vadd.f32 %v1703_v9, %v1646_v8  ;;  %v2923_v9 = vld [vmem:[%s3961_s3 + $0x18] sm:$0xff]  }
 0x198   :  { %v1137_v16 = vadd.f32 %v1136_v11, %v3618_v4 }
 0x199   :  { %1951 = vst [vmem:[#allocation3 + $0x10] sm:$0xff] %v1935_v48  ;;  %v1816_v61 = vadd.f32 %v1758_v17, %v1196_v23  ;;  %v2900_v23 = vunpack.c.h.bf16 %v2922_v38 }
 0x19a   :  { %v1197_v56 = vadd.f32 %v1137_v16, %v3615_v58  ;;  %v2903_v16 = vunpack.c.l.bf16 %v2923_v9 }
 0x19b   :  { %v1872_v24 = vadd.f32 %v3887_v13, %v1816_v61 }
 0x19d   :  { %v1920_v29 = vadd.f32 %v2896_v21, %v1872_v24  ;;  %v1648_v30 = vpop.f32.mrf.mxu2 }
 0x19e   :  { %v1705_v35 = vpop.f32.mrf.mxu3  ;;  %v1760_v49 = vpop.f32.mrf.mxu0 }
 0x19f   :  { %v1139_v22 = vpop.f32.mrf.mxu1  ;;  %v1936_v39 = vmax.f32 %v1920_v29, 0.0  ;;  %v1761_v62 = vadd.f32 %v1760_v49, %v1704_v34  ;;  %v1706_v45 = vadd.f32 %v1705_v35, %v1648_v30  ;;  %v2904_v49 = vunpack.c.h.bf16 %v2923_v9 }
 0x1a0   :  { %v1140_v4 = vadd.f32 %v1139_v22, %v3647_v27 }
 0x1a1   :  { %1952 = vst [vmem:[#allocation3 + $0x18] sm:$0xff] %v1936_v39  ;;  %v1817_v3 = vadd.f32 %v1761_v62, %v1197_v56 }
 0x1a2   :  { %v1198_v58 = vadd.f32 %v1140_v4, %v3620_v5 }
 0x1a3   :  { %v1873_v41 = vadd.f32 %v3887_v13, %v1817_v3 }
 0x1a5   :  { %v1921_v46 = vadd.f32 %v2899_v26, %v1873_v41  ;;  %v1651_v47 = vpop.f32.mrf.mxu2 }
 0x1a6   :  { %v1708_v52 = vpop.f32.mrf.mxu3  ;;  %v1762_v6 = vpop.f32.mrf.mxu0 }
 0x1a7   :  { %v1141_v53 = vpop.f32.mrf.mxu1  ;;  %v1937_v59 = vmax.f32 %v1921_v46, 0.0  ;;  %v1763_v31 = vadd.f32 %v1762_v6, %v1706_v45  ;;  %v1709_v5 = vadd.f32 %v1708_v52, %v1651_v47 }
 0x1a8   :  { %v1142_v60 = vadd.f32 %v1141_v53, %v3652_v10 }
 0x1a9   :  { %1953 = vst [vmem:[#allocation3 + $0x20] sm:$0xff] %v1937_v59  ;;  %v1818_v20 = vadd.f32 %v1763_v31, %v1198_v58  ;;  %v2924_v31 = vld [vmem:[%s3961_s3 + $0x20] sm:$0xff]  }
 0x1aa   :  { %v1199_v27 = vadd.f32 %v1142_v60, %v3649_v28 }
 0x1ab   :  { %v1874_v2 = vadd.f32 %v3887_v13, %v1818_v20 }
 0x1ad   :  { %v1922_v0 = vadd.f32 %v2900_v23, %v1874_v2  ;;  %v1653_v57 = vpop.f32.mrf.mxu2  ;;  %v2907_v2 = vunpack.c.l.bf16 %v2924_v31 }
 0x1ae   :  { %v1710_v25 = vpop.f32.mrf.mxu3  ;;  %v1765_v8 = vpop.f32.mrf.mxu0 }
 0x1af   :  { %v1144_v50 = vpop.f32.mrf.mxu1  ;;  %v1938_v11 = vmax.f32 %v1922_v0, 0.0  ;;  %v1766_v12 = vadd.f32 %v1765_v8, %v1709_v5  ;;  %v1711_v56 = vadd.f32 %v1710_v25, %v1653_v57 }
 0x1b0   :  { %v1145_v10 = vadd.f32 %v1144_v50, %v3680_v63 }
 0x1b1   :  { %1954 = vst [vmem:[#allocation3 + $0x28] sm:$0xff] %v1938_v11  ;;  %v1819_v48 = vadd.f32 %v1766_v12, %v1199_v27 }
 0x1b2   :  { %v1200_v28 = vadd.f32 %v1145_v10, %v3654_v37 }
 0x1b3   :  { %v1875_v17 = vadd.f32 %v3887_v13, %v1819_v48 }
 0x1b5   :  { %v1923_v61 = vadd.f32 %v2903_v16, %v1875_v17  ;;  %v1656_v21 = vpop.f32.mrf.mxu2 }
 0x1b6   :  { %v1713_v34 = vpop.f32.mrf.mxu3  ;;  %v1767_v29 = vpop.f32.mrf.mxu0 }
 0x1b7   :  { %v1146_v24 = vpop.f32.mrf.mxu1  ;;  %v1939_v30 = vmax.f32 %v1923_v61, 0.0  ;;  %v1768_v35 = vadd.f32 %v1767_v29, %v1711_v56  ;;  %v2925_v34 = vld [vmem:[%s3961_s3 + $0x28] sm:$0xff]  }
 0x1b9   :  { %1955 = vst [vmem:[#allocation3 + $0x30] sm:$0xff] %v1939_v30  ;;  %v1820_v22 = vadd.f32 %v1768_v35, %v1200_v28  ;;  %v2908_v28 = vunpack.c.h.bf16 %v2924_v31  ;;  %v2911_v35 = vunpack.c.l.bf16 %v2925_v34 }
 0x1bb   :  { %v1876_v63 = vadd.f32 %v3887_v13, %v1820_v22 }
 0x1bd   :  { %v1924_v38 = vadd.f32 %v2904_v49, %v1876_v63  ;;  %v1658_v39 = vpop.f32.mrf.mxu2 }
 0x1be   :  { %v1715_v37 = vpop.f32.mrf.mxu3  ;;  %v1770_v62 = vpop.f32.mrf.mxu0 }
 0x1bf   :  { %v1149_v4 = vpop.f32.mrf.mxu1  ;;  %v1940_v58 = vmax.f32 %v1924_v38, 0.0 }
 0x1c1   :  { %1956 = vst [vmem:[#allocation3 + $0x38] sm:$0xff] %v1940_v58 }
 0x1c5   :  { %v1661_v3 = vpop.f32.mrf.mxu2 }
 0x1c6   :  { %v1718_v26 = vpop.f32.mrf.mxu3  ;;  %v1772_v45 = vpop.f32.mrf.mxu0 }
 0x1c7   :  { %v1151_v41 = vpop.f32.mrf.mxu1  ;;  %v1719_v52 = vadd.f32 %v1718_v26, %v1661_v3 }
 0x1c8   :  { %v1152_v46 = vadd.f32 %v1151_v41, %v3710_v51  ;;  %v2912_v41 = vunpack.c.h.bf16 %v2925_v34 }
 0x1ca   :  { %v1203_v47 = vadd.f32 %v1152_v46, %v3707_v1 }
 0x1cd   :  { %v1663_v53 = vpop.f32.mrf.mxu2 }
 0x1ce   :  { %v1720_v6 = vpop.f32.mrf.mxu3  ;;  %v1775_v60 = vpop.f32.mrf.mxu0 }
 0x1cf   :  { %v1154_v59 = vpop.f32.mrf.mxu1  ;;  %v1776_v20 = vadd.f32 %v1775_v60, %v1719_v52  ;;  %v1721_v0 = vadd.f32 %v1720_v6, %v1663_v53 }
 0x1d0   :  { %v1155_v27 = vadd.f32 %v1154_v59, %v3739_v7  ;;  %v2926_v59 = vld [vmem:[%s3961_s3 + $0x30] sm:$0xff]  }
 0x1d1   :  { %v1823_v5 = vadd.f32 %v1776_v20, %v1203_v47  ;;  %v2915_v20 = vunpack.c.l.bf16 %v2926_v59 }
 0x1d2   :  { %v1204_v23 = vadd.f32 %v1155_v27, %v3712_v40 }
 0x1d3   :  { %v1877_v51 = vadd.f32 %v3887_v13, %v1823_v5 }
 0x1d5   :  { %v1925_v1 = vadd.f32 %v2907_v2, %v1877_v51  ;;  %v1666_v57 = vpop.f32.mrf.mxu2 }
 0x1d6   :  { %v1723_v25 = vpop.f32.mrf.mxu3  ;;  %v1777_v8 = vpop.f32.mrf.mxu0 }
 0x1d7   :  { %v1156_v50 = vpop.f32.mrf.mxu1  ;;  %v1941_v9 = vmax.f32 %v1925_v1, 0.0  ;;  %v1778_v10 = vadd.f32 %v1777_v8, %v1721_v0  ;;  %v1724_v40 = vadd.f32 %v1723_v25, %v1666_v57 }
 0x1d8   :  { %v1157_v11 = vadd.f32 %v1156_v50, %v3744_v14 }
 0x1d9   :  { %1957 = vst [vmem:[#allocation3 + $0x40] sm:$0xff] %v1941_v9  ;;  %v1824_v12 = vadd.f32 %v1778_v10, %v1204_v23 }
 0x1da   :  { %v1205_v7 = vadd.f32 %v1157_v11, %v3741_v32  ;;  %v2916_v11 = vunpack.c.h.bf16 %v2926_v59 }
 0x1db   :  { %v1878_v48 = vadd.f32 %v3887_v13, %v1824_v12 }
 0x1dd   :  { %v1926_v16 = vadd.f32 %v2908_v28, %v1878_v48  ;;  %v1668_v17 = vpop.f32.mrf.mxu2 }
 0x1de   :  { %v1725_v56 = vpop.f32.mrf.mxu3  ;;  %v1780_v21 = vpop.f32.mrf.mxu0 }
 0x1df   :  { %v1159_v61 = vpop.f32.mrf.mxu1  ;;  %v1942_v24 = vmax.f32 %v1926_v16, 0.0  ;;  %v1781_v29 = vadd.f32 %v1780_v21, %v1724_v40  ;;  %v1726_v49 = vadd.f32 %v1725_v56, %v1668_v17  ;;  %v2927_v40 = vld [vmem:[%s3961_s3 + $0x38] sm:$0xff]   ;;  %s2982_s3 = smov [#allocation3]  }
 0x1e0   :  { %v1160_v14 = vadd.f32 %v1159_v61, %v3773_v44  ;;  %v2919_v56 = vunpack.c.l.bf16 %v2927_v40  ;;  %s1969_s7 = sshll.u32 %s2982_s3, 4  ;;  %s1970_s7 = int_to_ptr.vmem [resolvable:$true] %s1969_s7 }
 0x1e1   :  { %1958 = vst [vmem:[#allocation3 + $0x48] sm:$0xff] %v1942_v24  ;;  %v1825_v30 = vadd.f32 %v1781_v29, %v1205_v7 }
 0x1e2   :  { %v1206_v32 = vadd.f32 %v1160_v14, %v3746_v15 }
 0x1e3   :  { %v1879_v22 = vadd.f32 %v3887_v13, %v1825_v30 }
 0x1e5   :  { %v1927_v63 = vadd.f32 %v2911_v35, %v1879_v22  ;;  %v1671_v38 = vpop.f32.mrf.mxu2 }
 0x1e6   :  { %v1728_v39 = vpop.f32.mrf.mxu3  ;;  %v1782_v4 = vpop.f32.mrf.mxu0 }
 0x1e7   :  { %v1161_v37 = vpop.f32.mrf.mxu1  ;;  %v1943_v62 = vmax.f32 %v1927_v63, 0.0  ;;  %v1783_v3 = vadd.f32 %v1782_v4, %v1726_v49  ;;  %v1729_v15 = vadd.f32 %v1728_v39, %v1671_v38  ;;  %v2920_v49 = vunpack.c.h.bf16 %v2927_v40 }
 0x1e8   :  { %v1162_v58 = vadd.f32 %v1161_v37, %v3778_v54 }
 0x1e9   :  { %1959 = vst [vmem:[#allocation3 + $0x50] sm:$0xff] %v1943_v62  ;;  %v1826_v26 = vadd.f32 %v1783_v3, %v1206_v32 }
 0x1ea   :  { %v1207_v44 = vadd.f32 %v1162_v58, %v3775_v33 }
 0x1eb   :  { %v1880_v45 = vadd.f32 %v3887_v13, %v1826_v26 }
 0x1ed   :  { %v1928_v46 = vadd.f32 %v2912_v41, %v1880_v45  ;;  %v1673_v47 = vpop.f32.mrf.mxu2 }
 0x1ee   :  { %v1730_v52 = vpop.f32.mrf.mxu3  ;;  %v1785_v6 = vpop.f32.mrf.mxu0 }
 0x1ef   :  { %v1164_v53 = vpop.f32.mrf.mxu1  ;;  %v1944_v60 = vmax.f32 %v1928_v46, 0.0  ;;  %v1786_v31 = vadd.f32 %v1785_v6, %v1729_v15  ;;  %v1731_v5 = vadd.f32 %v1730_v52, %v1673_v47 }
 0x1f0   :  { %v1165_v54 = vadd.f32 %v1164_v53, %v3807_v18 }
 0x1f1   :  { %1960 = vst [vmem:[#allocation3 + $0x58] sm:$0xff] %v1944_v60  ;;  %v1827_v27 = vadd.f32 %v1786_v31, %v1207_v44 }
 0x1f2   :  { %v1208_v33 = vadd.f32 %v1165_v54, %v3780_v55 }
 0x1f3   :  { %v1881_v23 = vadd.f32 %v3887_v13, %v1827_v27 }
 0x1f5   :  { %v1929_v2 = vadd.f32 %v2915_v20, %v1881_v23  ;;  %v1676_v50 = vpop.f32.mrf.mxu2 }
 0x1f6   :  { %v1787_v0 = vpop.f32.mrf.mxu0  ;;  %v1733_v8 = vpop.f32.mrf.mxu3 }
 0x1f7   :  { %v1166_v51 = vpop.f32.mrf.mxu1  ;;  %v1945_v1 = vmax.f32 %v1929_v2, 0.0  ;;  %v1788_v25 = vadd.f32 %v1787_v0, %v1731_v5  ;;  %v1734_v55 = vadd.f32 %v1733_v8, %v1676_v50 }
 0x1f8   :  { %v1167_v57 = vadd.f32 %v1166_v51, %v3812_v36 }
 0x1f9   :  { %1961 = vst [vmem:[#allocation3 + $0x60] sm:$0xff] %v1945_v1  ;;  %v1828_v9 = vadd.f32 %v1788_v25, %v1208_v33 }
 0x1fa   :  { %v1209_v18 = vadd.f32 %v1167_v57, %v3809_v19 }
 0x1fb   :  { %v1882_v10 = vadd.f32 %v3887_v13, %v1828_v9 }
 0x1fd   :  { %v1930_v7 = vadd.f32 %v2916_v11, %v1882_v10  ;;  %v1678_v61 = vpop.f32.mrf.mxu2 }
 0x1fe   :  { %v1790_v28 = vpop.f32.mrf.mxu0  ;;  %v1735_v21 = vpop.f32.mrf.mxu3 }
 0x1ff   :  { %v1169_v12 = vpop.f32.mrf.mxu1  ;;  %v1946_v48 = vmax.f32 %v1930_v7, 0.0  ;;  %v1791_v16 = vadd.f32 %v1790_v28, %v1734_v55  ;;  %v1736_v24 = vadd.f32 %v1735_v21, %v1678_v61 }
 0x200   :  { %v1170_v36 = vadd.f32 %v1169_v12, %v3840_v42 }
 0x201   :  { %1962 = vst [vmem:[#allocation3 + $0x68] sm:$0xff] %v1946_v48  ;;  %v1829_v19 = vadd.f32 %v1791_v16, %v1209_v18 }
 0x202   :  { %v1210_v17 = vadd.f32 %v1170_v36, %v3814_v43 }
 0x203   :  { %v1883_v34 = vadd.f32 %v3887_v13, %v1829_v19 }
 0x205   :  { %v1931_v14 = vadd.f32 %v2919_v56, %v1883_v34 }
 0x206   :  { %v1792_v32 = vpop.f32.mrf.mxu0 }
 0x207   :  { %v1171_v29 = vpop.f32.mrf.mxu1  ;;  %v1947_v30 = vmax.f32 %v1931_v14, 0.0  ;;  %v1793_v35 = vadd.f32 %v1792_v32, %v1736_v24 }
 0x209   :  { %1963 = vst [vmem:[#allocation3 + $0x70] sm:$0xff] %v1947_v30  ;;  %v1830_v22 = vadd.f32 %v1793_v35, %v1210_v17 }
 0x20b   :  { %v1884_v42 = vadd.f32 %v3887_v13, %v1830_v22 }
 0x20d   :  { %v1932_v43 = vadd.f32 %v2920_v49, %v1884_v42 }
 0x20f   :  { %v1948_v63 = vmax.f32 %v1932_v43, 0.0 }
 0x211   :  { %1964 = vst [vmem:[#allocation3 + $0x78] sm:$0xff] %v1948_v63 }
 0x212   :  { %1977 = dma.vmem_to_hbm [thread:$0]  %s1970_s7, 2048, %s1972_s10, [#allocation4], %s2983_s11, %s2983_s11, %s2984_s12  }
 0x213   :  { %2980 = dma.done.wait [#allocation4], 2048  }
 0x214   :  { %2981 = vsyncadd [#allocation4], 4294965248 }
 0x215   :  { %1982 = vsyncpa [#allocation4], 1 }

</bundles_post_ra>
